<compile_context>
chip_gen: v6e
topology: v6e:2x2x1
jax: 0.10.0
libtpu: 0.0.40
codegen_flags: <defaults>
</compile_context>

<pallas_src>
import functools

import jax
import jax.numpy as jnp
from jax import lax
from jax.experimental import pallas as pl
from jax.experimental.pallas import tpu as pltpu

EPS = 1e-5
MXU_DTYPE = jnp.bfloat16          # MXU operands; accumulation stays f32
LANE = 128
SUBLANE = 8
VMEM_BUDGET = 16 * 1024 * 1024    # conservative per-call working budget (v7x-safe)
VMEM_LIMIT = 32 * 1024 * 1024     # scoped VMEM limit handed to Mosaic


def _round_up(x, m):
    return (x + m - 1) // m * m


def _pick_tile_r(R, K, Cpad, max_tile_r=2048):
    """Largest row tile that fits the (double-buffered) working set in budget."""
    bytes_fixed = 2 * K * Cpad * 2 + 4 * SUBLANE * Cpad * 4        # weights + stats
    bytes_per_row = 2 * K * 2 + 2 * Cpad * 4                       # x tile + y tile
    tile = (VMEM_BUDGET - bytes_fixed) // bytes_per_row
    tile = int(max(2 * SUBLANE, min(tile, max_tile_r, _round_up(R, SUBLANE))))
    if tile >= LANE:
        tile = (tile // LANE) * LANE      # lane/sublane friendly, bf16-pack friendly
    else:
        tile = _round_up(tile, 2 * SUBLANE)
    return tile


# --------------------------------------------------------------------------
# Kernel 1: row-tiled GEMM (= conv after im2col) + per-tile channel stats.
# --------------------------------------------------------------------------
def _conv_gemm_stats_kernel(x_ref, w_ref, y_ref, sum_ref, sq_ref):
    # bf16 operands, f32 accumulation on the MXU.
    acc = jnp.dot(x_ref[...], w_ref[...], preferred_element_type=jnp.float32)
    y_ref[...] = acc
    # Per-channel partial sums for this row tile (global BN stats are finished
    # in the wrapper so that row tiling stays numerically correct).
    s = jnp.sum(acc, axis=0, keepdims=True)            # (1, Cpad)
    sq = jnp.sum(acc * acc, axis=0, keepdims=True)     # (1, Cpad)
    sum_ref[...] = jnp.broadcast_to(s, sum_ref.shape)  # (1, 8, Cpad)
    sq_ref[...] = jnp.broadcast_to(sq, sq_ref.shape)


def conv_gemm_stats(x2d, w2d, *, Cpad, tile_r):
    """x2d: (R, K); w2d: (K, Cout).  Returns raw conv output (R_pad, Cpad) f32
    plus per-channel sum and sum-of-squares over the true R rows."""
    R, K = x2d.shape
    Cout = w2d.shape[1]
    R_pad = _round_up(R, tile_r)
    n_tiles = R_pad // tile_r

    # Zero row-padding contributes 0 to sum/sumsq -> stats stay exact.
    x_p = jnp.pad(x2d.astype(MXU_DTYPE), ((0, R_pad - R), (0, 0)))
    w_p = jnp.pad(w2d.astype(MXU_DTYPE), ((0, 0), (0, Cpad - Cout)))

    y, s, sq = pl.pallas_call(
        _conv_gemm_stats_kernel,
        out_shape=(
            jax.ShapeDtypeStruct((R_pad, Cpad), jnp.float32),
            jax.ShapeDtypeStruct((n_tiles, SUBLANE, Cpad), jnp.float32),
            jax.ShapeDtypeStruct((n_tiles, SUBLANE, Cpad), jnp.float32),
        ),
        grid=(n_tiles,),
        in_specs=[
            pl.BlockSpec((tile_r, K), lambda i: (i, 0)),
            pl.BlockSpec((K, Cpad), lambda i: (0, 0)),      # weights stay resident
        ],
        out_specs=(
            pl.BlockSpec((tile_r, Cpad), lambda i: (i, 0)),
            pl.BlockSpec((1, SUBLANE, Cpad), lambda i: (i, 0, 0)),
            pl.BlockSpec((1, SUBLANE, Cpad), lambda i: (i, 0, 0)),
        ),
        compiler_params=pltpu.CompilerParams(
            dimension_semantics=("parallel",),      # row tiles shard across TCs (v7x)
            vmem_limit_bytes=VMEM_LIMIT,
        ),
    )(x_p, w_p)

    ch_sum = s[:, 0, :].sum(axis=0)     # (Cpad,)
    ch_sq = sq[:, 0, :].sum(axis=0)     # (Cpad,)
    return y, ch_sum, ch_sq, R_pad


def _bn_scale_shift(ch_sum, ch_sq, n_rows, gamma, beta):
    """Finish BN batch statistics (biased var) -> per-channel scale/shift."""
    Cpad = ch_sum.shape[0]
    Cout = gamma.shape[0]
    mean = ch_sum / n_rows
    var = jnp.maximum(ch_sq / n_rows - mean * mean, 0.0)
    g = jnp.pad(gamma.astype(jnp.float32), (0, Cpad - Cout))
    b = jnp.pad(beta.astype(jnp.float32), (0, Cpad - Cout))
    scale = g * lax.rsqrt(var + EPS)
    shift = b - mean * scale
    return scale.reshape(1, Cpad), shift.reshape(1, Cpad)


# --------------------------------------------------------------------------
# Kernel 2: epilogue -- per-channel affine (+ normalized residual) + ReLU.
# --------------------------------------------------------------------------
def _bn_act_kernel(*refs, has_residual: bool, apply_relu: bool):
    if has_residual:
        y_ref, sc_ref, sh_ref, r_ref, rsc_ref, rsh_ref, o_ref = refs
    else:
        y_ref, sc_ref, sh_ref, o_ref = refs
    out = y_ref[...] * sc_ref[...] + sh_ref[...]
    if has_residual:
        out = out + (r_ref[...] * rsc_ref[...] + rsh_ref[...])
    if apply_relu:
        out = jnp.maximum(out, 0.0)
    o_ref[...] = out.astype(o_ref.dtype)


def bn_act(y, scale, shift, residual=None, res_scale=None, res_shift=None,
           *, apply_relu=True, tile_r):
    R_pad, Cpad = y.shape
    n_tiles = R_pad // tile_r
    has_res = residual is not None
    kernel = functools.partial(_bn_act_kernel,
                               has_residual=has_res, apply_relu=apply_relu)

    row_spec = pl.BlockSpec((tile_r, Cpad), lambda i: (i, 0))
    vec_spec = pl.BlockSpec((1, Cpad), lambda i: (0, 0))
    inputs = [y, scale, shift]
    in_specs = [row_spec, vec_spec, vec_spec]
    if has_res:
        inputs += [residual, res_scale, res_shift]
        in_specs += [row_spec, vec_spec, vec_spec]

    return pl.pallas_call(
        kernel,
        out_shape=jax.ShapeDtypeStruct((R_pad, Cpad), jnp.float32),
        grid=(n_tiles,),
        in_specs=in_specs,
        out_specs=row_spec,
        compiler_params=pltpu.CompilerParams(
            dimension_semantics=("parallel",),
            vmem_limit_bytes=VMEM_LIMIT,
        ),
    )(*inputs)


# --------------------------------------------------------------------------
# Glue: im2col for a 3x3 / stride-1 / pad-1 convolution (NHWC) + weight reshape.
# --------------------------------------------------------------------------
def _im2col_3x3(x_nhwc):
    N, H, W, C = x_nhwc.shape
    xp = jnp.pad(x_nhwc, ((0, 0), (1, 1), (1, 1), (0, 0)))
    cols = [xp[:, dh:dh + H, dw:dw + W, :] for dh in range(3) for dw in range(3)]
    return jnp.concatenate(cols, axis=-1).reshape(N * H * W, 9 * C)


def _w3x3_to_gemm(w_oihw):
    """PyTorch (Cout, Cin, 3, 3) -> (9*Cin, Cout), matching im2col order."""
    Cout, Cin, _, _ = w_oihw.shape
    return jnp.transpose(w_oihw, (2, 3, 1, 0)).reshape(9 * Cin, Cout)


# --------------------------------------------------------------------------
# BasicBlock forward (stride = 1).
# --------------------------------------------------------------------------
def basic_block_forward(x_nchw, params, *, tile_r=None, max_tile_r=2048):
    x = jnp.transpose(x_nchw, (0, 2, 3, 1)).astype(jnp.float32)   # NCHW -> NHWC
    N, H, W, Cin = x.shape
    planes = params["conv1_w"].shape[0]
    R = N * H * W
    Cpad = _round_up(planes, LANE)

    if tile_r is None:
        tile_r = _pick_tile_r(R, max(9 * Cin, 9 * planes, Cin), Cpad, max_tile_r)

    # conv1 -> (global) bn1 stats -> bn1 + relu epilogue
    y1, s1, q1, R_pad = conv_gemm_stats(
        _im2col_3x3(x), _w3x3_to_gemm(params["conv1_w"]), Cpad=Cpad, tile_r=tile_r)
    sc1, sh1 = _bn_scale_shift(s1, q1, R, params["bn1_g"], params["bn1_b"])
    out1 = bn_act(y1, sc1, sh1, apply_relu=True, tile_r=tile_r)     # (R_pad, Cpad)

    # shortcut: 1x1 conv + bn iff in_planes != planes (stride = 1 here)
    x2d = x.reshape(R, Cin)
    if Cin != planes:
        ws = jnp.transpose(params["sc_w"].reshape(planes, Cin), (1, 0))
        res, ss, qs, _ = conv_gemm_stats(x2d, ws, Cpad=Cpad, tile_r=tile_r)
        res_scale, res_shift = _bn_scale_shift(ss, qs, R, params["sc_g"], params["sc_b"])
    else:
        res = jnp.pad(x2d, ((0, R_pad - R), (0, Cpad - Cin)))
        res_scale = jnp.ones((1, Cpad), jnp.float32)
        res_shift = jnp.zeros((1, Cpad), jnp.float32)

    # conv2 -> (global) bn2 stats -> bn2 + shortcut add + relu epilogue (fused)
    out1_img = out1[:R, :planes].reshape(N, H, W, planes)
    y2, s2, q2, _ = conv_gemm_stats(
        _im2col_3x3(out1_img), _w3x3_to_gemm(params["conv2_w"]), Cpad=Cpad, tile_r=tile_r)
    sc2, sh2 = _bn_scale_shift(s2, q2, R, params["bn2_g"], params["bn2_b"])
    out = bn_act(y2, sc2, sh2, residual=res, res_scale=res_scale, res_shift=res_shift,
                 apply_relu=True, tile_r=tile_r)

    out = out[:R, :planes].reshape(N, H, W, planes)
    return jnp.transpose(out, (0, 3, 1, 2))                         # NHWC -> NCHW


# --------------------------------------------------------------------------
# Pure-JAX references (correctness check only).
# --------------------------------------------------------------------------
def _ref_bn(y, g, b):
    mean = jnp.mean(y, axis=(0, 2, 3), keepdims=True)
    var = jnp.var(y, axis=(0, 2, 3), keepdims=True)    # biased
    return (y - mean) * lax.rsqrt(var + EPS) * g.reshape(1, -1, 1, 1) \
        + b.reshape(1, -1, 1, 1)


def _ref_conv(x, w, pad, mxu_dtype=None):
    if mxu_dtype is not None:                          # match kernel MXU precision
        x = x.astype(mxu_dtype)
        w = w.astype(mxu_dtype)
    return lax.conv_general_dilated(
        x, w, window_strides=(1, 1), padding=((pad, pad), (pad, pad)),
        dimension_numbers=("NCHW", "OIHW", "NCHW"),
        preferred_element_type=jnp.float32)


def basic_block_reference(x, p, mxu_dtype=None):
    conv = functools.partial(_ref_conv, mxu_dtype=mxu_dtype)
    out1 = jax.nn.relu(_ref_bn(conv(x, p["conv1_w"], 1), p["bn1_g"], p["bn1_b"]))
    out = _ref_bn(conv(out1, p["conv2_w"], 1), p["bn2_g"], p["bn2_b"])
    if p["conv1_w"].shape[1] != p["conv1_w"].shape[0]:
        sc = _ref_bn(conv(x, p["sc_w"], 0), p["sc_g"], p["sc_b"])
    else:
        sc = x
    return jax.nn.relu(out + sc)


# --------------------------------------------------------------------------
if __name__ == "__main__":
    N, Cin, H, W = 2, 4, 16, 16
    planes = 8
    key = jax.random.PRNGKey(0)
    k1, k2, k3, k4, kx, kx2 = jax.random.split(key, 6)

    def kaiming(k, shape):
        fan_in = shape[1] * shape[2] * shape[3]
        return jax.random.normal(k, shape, jnp.float32) * jnp.sqrt(2.0 / fan_in)

    fwd = jax.jit(basic_block_forward, static_argnames=("tile_r", "max_tile_r"))

    # Case 1: in_planes != planes -> 1x1-conv + BN shortcut branch.
    params = {
        "conv1_w": kaiming(k1, (planes, Cin, 3, 3)),
        "bn1_g": jnp.ones((planes,), jnp.float32),
        "bn1_b": jnp.zeros((planes,), jnp.float32),
        "conv2_w": kaiming(k2, (planes, planes, 3, 3)),
        "bn2_g": jnp.ones((planes,), jnp.float32),
        "bn2_b": jnp.zeros((planes,), jnp.float32),
        "sc_w": kaiming(k3, (planes, Cin, 1, 1)),
        "sc_g": jnp.ones((planes,), jnp.float32),
        "sc_b": jnp.zeros((planes,), jnp.float32),
    }
    x = jax.random.normal(kx, (N, Cin, H, W), jnp.float32)

    # tile_r=128 forces multiple row tiles -> exercises cross-tile BN statistics.
    out = jax.block_until_ready(fwd(x, params, tile_r=128))
    ref_matched = basic_block_reference(x, params, mxu_dtype=MXU_DTYPE)
    ref_f32 = basic_block_reference(x, params, mxu_dtype=None)

    assert out.shape == (N, planes, H, W), out.shape
    err_m = float(jnp.max(jnp.abs(out - ref_matched)))
    err_f = float(jnp.max(jnp.abs(out - ref_f32)))
    assert err_m < 1e-2, ("bf16-matched reference mismatch", err_m)
    assert err_f < 1.5e-1, ("f32 reference sanity mismatch", err_f)

    # Case 2: in_planes == planes -> identity shortcut branch.
    params_id = {
        "conv1_w": kaiming(k1, (planes, planes, 3, 3)),
        "bn1_g": jnp.ones((planes,), jnp.float32),
        "bn1_b": jnp.zeros((planes,), jnp.float32),
        "conv2_w": kaiming(k4, (planes, planes, 3, 3)),
        "bn2_g": jnp.ones((planes,), jnp.float32),
        "bn2_b": jnp.zeros((planes,), jnp.float32),
    }
    x2 = jax.random.normal(kx2, (N, planes, H, W), jnp.float32)
    out2 = jax.block_until_ready(fwd(x2, params_id, tile_r=128))
    ref2 = basic_block_reference(x2, params_id, mxu_dtype=MXU_DTYPE)
    assert out2.shape == (N, planes, H, W), out2.shape
    assert float(jnp.max(jnp.abs(out2 - ref2))) < 1e-2

    print("KERNEL_OK")
</pallas_src>

<mosaic_0001>
module attributes {stable_mosaic.version = 11 : i64} {
  func.func @_conv_gemm_stats_kernel(%arg0: i32, %arg1: memref<128x36xbf16, #tpu.memory_space<vmem>>, %arg2: memref<36x128xbf16, #tpu.memory_space<vmem>>, %arg3: memref<128x128xf32, #tpu.memory_space<vmem>>, %arg4: memref<1x8x128xf32, #tpu.memory_space<vmem>>, %arg5: memref<1x8x128xf32, #tpu.memory_space<vmem>>) attributes {dimension_semantics = [#tpu.dimension_semantics<parallel>], iteration_bounds = array<i64: 4>, scalar_prefetch = 0 : i64, scratch_operands = 0 : i64, tpu.core_type = #tpu.core_type<tc>, window_params = [{transform_indices = @transform_0, window_bounds = array<i64: 128, 36>}, {pipeline_mode = #tpu.pipeline_mode<synchronous>, transform_indices = @transform_1, window_bounds = array<i64: 36, 128>}, {transform_indices = @transform_2, window_bounds = array<i64: 128, 128>}, {transform_indices = @transform_3, window_bounds = array<i64: 1, 8, 128>}, {transform_indices = @transform_4, window_bounds = array<i64: 1, 8, 128>}]} {
    %c0 = arith.constant 0 : index
    %c0_0 = arith.constant 0 : index
    %0 = vector.load %arg1[%c0, %c0_0] : memref<128x36xbf16, #tpu.memory_space<vmem>>, vector<128x36xbf16>
    %c0_1 = arith.constant 0 : index
    %c0_2 = arith.constant 0 : index
    %1 = vector.load %arg2[%c0_1, %c0_2] : memref<36x128xbf16, #tpu.memory_space<vmem>>, vector<36x128xbf16>
    %cst = arith.constant dense<0.000000e+00> : vector<128x128xf32>
    %2 = tpu.matmul %0, %1, %cst {dimension_numbers = #tpu.dot_dimension_numbers<[1], [0], [0], [1], [0, 0, 1, 1], [], []>} : vector<128x36xbf16>, vector<36x128xbf16>, vector<128x128xf32> -> vector<128x128xf32>
    %c0_3 = arith.constant 0 : index
    %c0_4 = arith.constant 0 : index
    %3 = vector.load %arg3[%c0_3, %c0_4] : memref<128x128xf32, #tpu.memory_space<vmem>>, vector<128x128xf32>
    tpu.vector_store %arg3[%c0_3, %c0_4], %2 {strides = array<i32>} : memref<128x128xf32, #tpu.memory_space<vmem>>, vector<128x128xf32>,
    %cst_5 = arith.constant dense<0.000000e+00> : vector<128xf32>
    %4 = vector.multi_reduction <add>, %2, %cst_5 [0] : vector<128x128xf32> to vector<128xf32>
    %5 = vector.shape_cast %4 : vector<128xf32> to vector<1x128xf32>
    %6 = arith.mulf %2, %2 : vector<128x128xf32>
    %cst_6 = arith.constant dense<0.000000e+00> : vector<128xf32>
    %7 = vector.multi_reduction <add>, %6, %cst_6 [0] : vector<128x128xf32> to vector<128xf32>
    %8 = vector.shape_cast %7 : vector<128xf32> to vector<1x128xf32>
    %9 = vector.shape_cast %5 : vector<1x128xf32> to vector<1x1x128xf32>
    %10 = vector.broadcast %9 : vector<1x1x128xf32> to vector<1x8x128xf32>
    %c0_7 = arith.constant 0 : index
    %c0_8 = arith.constant 0 : index
    %c0_9 = arith.constant 0 : index
    %11 = vector.load %arg4[%c0_7, %c0_8, %c0_9] : memref<1x8x128xf32, #tpu.memory_space<vmem>>, vector<1x8x128xf32>
    tpu.vector_store %arg4[%c0_7, %c0_8, %c0_9], %10 {strides = array<i32>} : memref<1x8x128xf32, #tpu.memory_space<vmem>>, vector<1x8x128xf32>,
    %12 = vector.shape_cast %8 : vector<1x128xf32> to vector<1x1x128xf32>
    %13 = vector.broadcast %12 : vector<1x1x128xf32> to vector<1x8x128xf32>
    %c0_10 = arith.constant 0 : index
    %c0_11 = arith.constant 0 : index
    %c0_12 = arith.constant 0 : index
    %14 = vector.load %arg5[%c0_10, %c0_11, %c0_12] : memref<1x8x128xf32, #tpu.memory_space<vmem>>, vector<1x8x128xf32>
    tpu.vector_store %arg5[%c0_10, %c0_11, %c0_12], %13 {strides = array<i32>} : memref<1x8x128xf32, #tpu.memory_space<vmem>>, vector<1x8x128xf32>,
    return
  }
  func.func @transform_0(%arg0: i32) -> (i32, i32) {
    %c0_i32 = arith.constant 0 : i32
    %c0_i32_0 = arith.constant 0 : i32
    return %arg0, %c0_i32 : i32, i32
  }
  func.func @transform_1(%arg0: i32) -> (i32, i32) {
    %c0_i32 = arith.constant 0 : i32
    %c0_i32_0 = arith.constant 0 : i32
    %c0_i32_1 = arith.constant 0 : i32
    return %c0_i32, %c0_i32_0 : i32, i32
  }
  func.func @transform_2(%arg0: i32) -> (i32, i32) {
    %c0_i32 = arith.constant 0 : i32
    %c0_i32_0 = arith.constant 0 : i32
    return %arg0, %c0_i32 : i32, i32
  }
  func.func @transform_3(%arg0: i32) -> (i32, i32, i32) {
    %c0_i32 = arith.constant 0 : i32
    %c0_i32_0 = arith.constant 0 : i32
    %c0_i32_1 = arith.constant 0 : i32
    return %arg0, %c0_i32, %c0_i32_0 : i32, i32, i32
  }
  func.func @transform_4(%arg0: i32) -> (i32, i32, i32) {
    %c0_i32 = arith.constant 0 : i32
    %c0_i32_0 = arith.constant 0 : i32
    %c0_i32_1 = arith.constant 0 : i32
    return %arg0, %c0_i32, %c0_i32_0 : i32, i32, i32
  }
}

module attributes {stable_mosaic.version = 11 : i64} {
  func.func @_bn_act_kernel(%arg0: i32, %arg1: memref<128x128xf32, #tpu.memory_space<vmem>>, %arg2: memref<1x128xf32, #tpu.memory_space<vmem>>, %arg3: memref<1x128xf32, #tpu.memory_space<vmem>>, %arg4: memref<128x128xf32, #tpu.memory_space<vmem>>) attributes {dimension_semantics = [#tpu.dimension_semantics<parallel>], iteration_bounds = array<i64: 4>, scalar_prefetch = 0 : i64, scratch_operands = 0 : i64, tpu.core_type = #tpu.core_type<tc>, window_params = [{transform_indices = @transform_0, window_bounds = array<i64: 128, 128>}, {pipeline_mode = #tpu.pipeline_mode<synchronous>, transform_indices = @transform_1, window_bounds = array<i64: 1, 128>}, {pipeline_mode = #tpu.pipeline_mode<synchronous>, transform_indices = @transform_2, window_bounds = array<i64: 1, 128>}, {transform_indices = @transform_3, window_bounds = array<i64: 128, 128>}]} {
    %c0 = arith.constant 0 : index
    %c0_0 = arith.constant 0 : index
    %0 = vector.load %arg1[%c0, %c0_0] : memref<128x128xf32, #tpu.memory_space<vmem>>, vector<128x128xf32>
    %c0_1 = arith.constant 0 : index
    %c0_2 = arith.constant 0 : index
    %1 = vector.load %arg2[%c0_1, %c0_2] : memref<1x128xf32, #tpu.memory_space<vmem>>, vector<1x128xf32>
    %2 = vector.broadcast %1 : vector<1x128xf32> to vector<128x128xf32>
    %3 = arith.mulf %0, %2 : vector<128x128xf32>
    %c0_3 = arith.constant 0 : index
    %c0_4 = arith.constant 0 : index
    %4 = vector.load %arg3[%c0_3, %c0_4] : memref<1x128xf32, #tpu.memory_space<vmem>>, vector<1x128xf32>
    %5 = vector.broadcast %4 : vector<1x128xf32> to vector<128x128xf32>
    %6 = arith.addf %3, %5 : vector<128x128xf32>
    %cst = arith.constant 0.000000e+00 : f32
    %7 = vector.broadcast %cst : f32 to vector<128x128xf32>
    %8 = arith.maximumf %6, %7 : vector<128x128xf32>
    %c0_5 = arith.constant 0 : index
    %c0_6 = arith.constant 0 : index
    %9 = vector.load %arg4[%c0_5, %c0_6] : memref<128x128xf32, #tpu.memory_space<vmem>>, vector<128x128xf32>
    tpu.vector_store %arg4[%c0_5, %c0_6], %8 {strides = array<i32>} : memref<128x128xf32, #tpu.memory_space<vmem>>, vector<128x128xf32>,
    return
  }
  func.func @transform_0(%arg0: i32) -> (i32, i32) {
    %c0_i32 = arith.constant 0 : i32
    %c0_i32_0 = arith.constant 0 : i32
    return %arg0, %c0_i32 : i32, i32
  }
  func.func @transform_1(%arg0: i32) -> (i32, i32) {
    %c0_i32 = arith.constant 0 : i32
    %c0_i32_0 = arith.constant 0 : i32
    %c0_i32_1 = arith.constant 0 : i32
    return %c0_i32, %c0_i32_0 : i32, i32
  }
  func.func @transform_2(%arg0: i32) -> (i32, i32) {
    %c0_i32 = arith.constant 0 : i32
    %c0_i32_0 = arith.constant 0 : i32
    %c0_i32_1 = arith.constant 0 : i32
    return %c0_i32, %c0_i32_0 : i32, i32
  }
  func.func @transform_3(%arg0: i32) -> (i32, i32) {
    %c0_i32 = arith.constant 0 : i32
    %c0_i32_0 = arith.constant 0 : i32
    return %arg0, %c0_i32 : i32, i32
  }
}

module attributes {stable_mosaic.version = 11 : i64} {
  func.func @_conv_gemm_stats_kernel(%arg0: i32, %arg1: memref<128x72xbf16, #tpu.memory_space<vmem>>, %arg2: memref<72x128xbf16, #tpu.memory_space<vmem>>, %arg3: memref<128x128xf32, #tpu.memory_space<vmem>>, %arg4: memref<1x8x128xf32, #tpu.memory_space<vmem>>, %arg5: memref<1x8x128xf32, #tpu.memory_space<vmem>>) attributes {dimension_semantics = [#tpu.dimension_semantics<parallel>], iteration_bounds = array<i64: 4>, scalar_prefetch = 0 : i64, scratch_operands = 0 : i64, tpu.core_type = #tpu.core_type<tc>, window_params = [{transform_indices = @transform_0, window_bounds = array<i64: 128, 72>}, {pipeline_mode = #tpu.pipeline_mode<synchronous>, transform_indices = @transform_1, window_bounds = array<i64: 72, 128>}, {transform_indices = @transform_2, window_bounds = array<i64: 128, 128>}, {transform_indices = @transform_3, window_bounds = array<i64: 1, 8, 128>}, {transform_indices = @transform_4, window_bounds = array<i64: 1, 8, 128>}]} {
    %c0 = arith.constant 0 : index
    %c0_0 = arith.constant 0 : index
    %0 = vector.load %arg1[%c0, %c0_0] : memref<128x72xbf16, #tpu.memory_space<vmem>>, vector<128x72xbf16>
    %c0_1 = arith.constant 0 : index
    %c0_2 = arith.constant 0 : index
    %1 = vector.load %arg2[%c0_1, %c0_2] : memref<72x128xbf16, #tpu.memory_space<vmem>>, vector<72x128xbf16>
    %cst = arith.constant dense<0.000000e+00> : vector<128x128xf32>
    %2 = tpu.matmul %0, %1, %cst {dimension_numbers = #tpu.dot_dimension_numbers<[1], [0], [0], [1], [0, 0, 1, 1], [], []>} : vector<128x72xbf16>, vector<72x128xbf16>, vector<128x128xf32> -> vector<128x128xf32>
    %c0_3 = arith.constant 0 : index
    %c0_4 = arith.constant 0 : index
    %3 = vector.load %arg3[%c0_3, %c0_4] : memref<128x128xf32, #tpu.memory_space<vmem>>, vector<128x128xf32>
    tpu.vector_store %arg3[%c0_3, %c0_4], %2 {strides = array<i32>} : memref<128x128xf32, #tpu.memory_space<vmem>>, vector<128x128xf32>,
    %cst_5 = arith.constant dense<0.000000e+00> : vector<128xf32>
    %4 = vector.multi_reduction <add>, %2, %cst_5 [0] : vector<128x128xf32> to vector<128xf32>
    %5 = vector.shape_cast %4 : vector<128xf32> to vector<1x128xf32>
    %6 = arith.mulf %2, %2 : vector<128x128xf32>
    %cst_6 = arith.constant dense<0.000000e+00> : vector<128xf32>
    %7 = vector.multi_reduction <add>, %6, %cst_6 [0] : vector<128x128xf32> to vector<128xf32>
    %8 = vector.shape_cast %7 : vector<128xf32> to vector<1x128xf32>
    %9 = vector.shape_cast %5 : vector<1x128xf32> to vector<1x1x128xf32>
    %10 = vector.broadcast %9 : vector<1x1x128xf32> to vector<1x8x128xf32>
    %c0_7 = arith.constant 0 : index
    %c0_8 = arith.constant 0 : index
    %c0_9 = arith.constant 0 : index
    %11 = vector.load %arg4[%c0_7, %c0_8, %c0_9] : memref<1x8x128xf32, #tpu.memory_space<vmem>>, vector<1x8x128xf32>
    tpu.vector_store %arg4[%c0_7, %c0_8, %c0_9], %10 {strides = array<i32>} : memref<1x8x128xf32, #tpu.memory_space<vmem>>, vector<1x8x128xf32>,
    %12 = vector.shape_cast %8 : vector<1x128xf32> to vector<1x1x128xf32>
    %13 = vector.broadcast %12 : vector<1x1x128xf32> to vector<1x8x128xf32>
    %c0_10 = arith.constant 0 : index
    %c0_11 = arith.constant 0 : index
    %c0_12 = arith.constant 0 : index
    %14 = vector.load %arg5[%c0_10, %c0_11, %c0_12] : memref<1x8x128xf32, #tpu.memory_space<vmem>>, vector<1x8x128xf32>
    tpu.vector_store %arg5[%c0_10, %c0_11, %c0_12], %13 {strides = array<i32>} : memref<1x8x128xf32, #tpu.memory_space<vmem>>, vector<1x8x128xf32>,
    return
  }
  func.func @transform_0(%arg0: i32) -> (i32, i32) {
    %c0_i32 = arith.constant 0 : i32
    %c0_i32_0 = arith.constant 0 : i32
    return %arg0, %c0_i32 : i32, i32
  }
  func.func @transform_1(%arg0: i32) -> (i32, i32) {
    %c0_i32 = arith.constant 0 : i32
    %c0_i32_0 = arith.constant 0 : i32
    %c0_i32_1 = arith.constant 0 : i32
    return %c0_i32, %c0_i32_0 : i32, i32
  }
  func.func @transform_2(%arg0: i32) -> (i32, i32) {
    %c0_i32 = arith.constant 0 : i32
    %c0_i32_0 = arith.constant 0 : i32
    return %arg0, %c0_i32 : i32, i32
  }
  func.func @transform_3(%arg0: i32) -> (i32, i32, i32) {
    %c0_i32 = arith.constant 0 : i32
    %c0_i32_0 = arith.constant 0 : i32
    %c0_i32_1 = arith.constant 0 : i32
    return %arg0, %c0_i32, %c0_i32_0 : i32, i32, i32
  }
  func.func @transform_4(%arg0: i32) -> (i32, i32, i32) {
    %c0_i32 = arith.constant 0 : i32
    %c0_i32_0 = arith.constant 0 : i32
    %c0_i32_1 = arith.constant 0 : i32
    return %arg0, %c0_i32, %c0_i32_0 : i32, i32, i32
  }
}

module attributes {stable_mosaic.version = 11 : i64} {
  func.func @_conv_gemm_stats_kernel(%arg0: i32, %arg1: memref<128x4xbf16, #tpu.memory_space<vmem>>, %arg2: memref<4x128xbf16, #tpu.memory_space<vmem>>, %arg3: memref<128x128xf32, #tpu.memory_space<vmem>>, %arg4: memref<1x8x128xf32, #tpu.memory_space<vmem>>, %arg5: memref<1x8x128xf32, #tpu.memory_space<vmem>>) attributes {dimension_semantics = [#tpu.dimension_semantics<parallel>], iteration_bounds = array<i64: 4>, scalar_prefetch = 0 : i64, scratch_operands = 0 : i64, tpu.core_type = #tpu.core_type<tc>, window_params = [{transform_indices = @transform_0, window_bounds = array<i64: 128, 4>}, {pipeline_mode = #tpu.pipeline_mode<synchronous>, transform_indices = @transform_1, window_bounds = array<i64: 4, 128>}, {transform_indices = @transform_2, window_bounds = array<i64: 128, 128>}, {transform_indices = @transform_3, window_bounds = array<i64: 1, 8, 128>}, {transform_indices = @transform_4, window_bounds = array<i64: 1, 8, 128>}]} {
    %c0 = arith.constant 0 : index
    %c0_0 = arith.constant 0 : index
    %0 = vector.load %arg1[%c0, %c0_0] : memref<128x4xbf16, #tpu.memory_space<vmem>>, vector<128x4xbf16>
    %c0_1 = arith.constant 0 : index
    %c0_2 = arith.constant 0 : index
    %1 = vector.load %arg2[%c0_1, %c0_2] : memref<4x128xbf16, #tpu.memory_space<vmem>>, vector<4x128xbf16>
    %cst = arith.constant dense<0.000000e+00> : vector<128x128xf32>
    %2 = tpu.matmul %0, %1, %cst {dimension_numbers = #tpu.dot_dimension_numbers<[1], [0], [0], [1], [0, 0, 1, 1], [], []>} : vector<128x4xbf16>, vector<4x128xbf16>, vector<128x128xf32> -> vector<128x128xf32>
    %c0_3 = arith.constant 0 : index
    %c0_4 = arith.constant 0 : index
    %3 = vector.load %arg3[%c0_3, %c0_4] : memref<128x128xf32, #tpu.memory_space<vmem>>, vector<128x128xf32>
    tpu.vector_store %arg3[%c0_3, %c0_4], %2 {strides = array<i32>} : memref<128x128xf32, #tpu.memory_space<vmem>>, vector<128x128xf32>,
    %cst_5 = arith.constant dense<0.000000e+00> : vector<128xf32>
    %4 = vector.multi_reduction <add>, %2, %cst_5 [0] : vector<128x128xf32> to vector<128xf32>
    %5 = vector.shape_cast %4 : vector<128xf32> to vector<1x128xf32>
    %6 = arith.mulf %2, %2 : vector<128x128xf32>
    %cst_6 = arith.constant dense<0.000000e+00> : vector<128xf32>
    %7 = vector.multi_reduction <add>, %6, %cst_6 [0] : vector<128x128xf32> to vector<128xf32>
    %8 = vector.shape_cast %7 : vector<128xf32> to vector<1x128xf32>
    %9 = vector.shape_cast %5 : vector<1x128xf32> to vector<1x1x128xf32>
    %10 = vector.broadcast %9 : vector<1x1x128xf32> to vector<1x8x128xf32>
    %c0_7 = arith.constant 0 : index
    %c0_8 = arith.constant 0 : index
    %c0_9 = arith.constant 0 : index
    %11 = vector.load %arg4[%c0_7, %c0_8, %c0_9] : memref<1x8x128xf32, #tpu.memory_space<vmem>>, vector<1x8x128xf32>
    tpu.vector_store %arg4[%c0_7, %c0_8, %c0_9], %10 {strides = array<i32>} : memref<1x8x128xf32, #tpu.memory_space<vmem>>, vector<1x8x128xf32>,
    %12 = vector.shape_cast %8 : vector<1x128xf32> to vector<1x1x128xf32>
    %13 = vector.broadcast %12 : vector<1x1x128xf32> to vector<1x8x128xf32>
    %c0_10 = arith.constant 0 : index
    %c0_11 = arith.constant 0 : index
    %c0_12 = arith.constant 0 : index
    %14 = vector.load %arg5[%c0_10, %c0_11, %c0_12] : memref<1x8x128xf32, #tpu.memory_space<vmem>>, vector<1x8x128xf32>
    tpu.vector_store %arg5[%c0_10, %c0_11, %c0_12], %13 {strides = array<i32>} : memref<1x8x128xf32, #tpu.memory_space<vmem>>, vector<1x8x128xf32>,
    return
  }
  func.func @transform_0(%arg0: i32) -> (i32, i32) {
    %c0_i32 = arith.constant 0 : i32
    %c0_i32_0 = arith.constant 0 : i32
    return %arg0, %c0_i32 : i32, i32
  }
  func.func @transform_1(%arg0: i32) -> (i32, i32) {
    %c0_i32 = arith.constant 0 : i32
    %c0_i32_0 = arith.constant 0 : i32
    %c0_i32_1 = arith.constant 0 : i32
    return %c0_i32, %c0_i32_0 : i32, i32
  }
  func.func @transform_2(%arg0: i32) -> (i32, i32) {
    %c0_i32 = arith.constant 0 : i32
    %c0_i32_0 = arith.constant 0 : i32
    return %arg0, %c0_i32 : i32, i32
  }
  func.func @transform_3(%arg0: i32) -> (i32, i32, i32) {
    %c0_i32 = arith.constant 0 : i32
    %c0_i32_0 = arith.constant 0 : i32
    %c0_i32_1 = arith.constant 0 : i32
    return %arg0, %c0_i32, %c0_i32_0 : i32, i32, i32
  }
  func.func @transform_4(%arg0: i32) -> (i32, i32, i32) {
    %c0_i32 = arith.constant 0 : i32
    %c0_i32_0 = arith.constant 0 : i32
    %c0_i32_1 = arith.constant 0 : i32
    return %arg0, %c0_i32, %c0_i32_0 : i32, i32, i32
  }
}

module attributes {stable_mosaic.version = 11 : i64} {
  func.func @_bn_act_kernel(%arg0: i32, %arg1: memref<128x128xf32, #tpu.memory_space<vmem>>, %arg2: memref<1x128xf32, #tpu.memory_space<vmem>>, %arg3: memref<1x128xf32, #tpu.memory_space<vmem>>, %arg4: memref<128x128xf32, #tpu.memory_space<vmem>>, %arg5: memref<1x128xf32, #tpu.memory_space<vmem>>, %arg6: memref<1x128xf32, #tpu.memory_space<vmem>>, %arg7: memref<128x128xf32, #tpu.memory_space<vmem>>) attributes {dimension_semantics = [#tpu.dimension_semantics<parallel>], iteration_bounds = array<i64: 4>, scalar_prefetch = 0 : i64, scratch_operands = 0 : i64, tpu.core_type = #tpu.core_type<tc>, window_params = [{transform_indices = @transform_0, window_bounds = array<i64: 128, 128>}, {pipeline_mode = #tpu.pipeline_mode<synchronous>, transform_indices = @transform_1, window_bounds = array<i64: 1, 128>}, {pipeline_mode = #tpu.pipeline_mode<synchronous>, transform_indices = @transform_2, window_bounds = array<i64: 1, 128>}, {transform_indices = @transform_3, window_bounds = array<i64: 128, 128>}, {pipeline_mode = #tpu.pipeline_mode<synchronous>, transform_indices = @transform_4, window_bounds = array<i64: 1, 128>}, {pipeline_mode = #tpu.pipeline_mode<synchronous>, transform_indices = @transform_5, window_bounds = array<i64: 1, 128>}, {transform_indices = @transform_6, window_bounds = array<i64: 128, 128>}]} {
    %c0 = arith.constant 0 : index
    %c0_0 = arith.constant 0 : index
    %0 = vector.load %arg1[%c0, %c0_0] : memref<128x128xf32, #tpu.memory_space<vmem>>, vector<128x128xf32>
    %c0_1 = arith.constant 0 : index
    %c0_2 = arith.constant 0 : index
    %1 = vector.load %arg2[%c0_1, %c0_2] : memref<1x128xf32, #tpu.memory_space<vmem>>, vector<1x128xf32>
    %2 = vector.broadcast %1 : vector<1x128xf32> to vector<128x128xf32>
    %3 = arith.mulf %0, %2 : vector<128x128xf32>
    %c0_3 = arith.constant 0 : index
    %c0_4 = arith.constant 0 : index
    %4 = vector.load %arg3[%c0_3, %c0_4] : memref<1x128xf32, #tpu.memory_space<vmem>>, vector<1x128xf32>
    %5 = vector.broadcast %4 : vector<1x128xf32> to vector<128x128xf32>
    %6 = arith.addf %3, %5 : vector<128x128xf32>
    %c0_5 = arith.constant 0 : index
    %c0_6 = arith.constant 0 : index
    %7 = vector.load %arg4[%c0_5, %c0_6] : memref<128x128xf32, #tpu.memory_space<vmem>>, vector<128x128xf32>
    %c0_7 = arith.constant 0 : index
    %c0_8 = arith.constant 0 : index
    %8 = vector.load %arg5[%c0_7, %c0_8] : memref<1x128xf32, #tpu.memory_space<vmem>>, vector<1x128xf32>
    %9 = vector.broadcast %8 : vector<1x128xf32> to vector<128x128xf32>
    %10 = arith.mulf %7, %9 : vector<128x128xf32>
    %c0_9 = arith.constant 0 : index
    %c0_10 = arith.constant 0 : index
    %11 = vector.load %arg6[%c0_9, %c0_10] : memref<1x128xf32, #tpu.memory_space<vmem>>, vector<1x128xf32>
    %12 = vector.broadcast %11 : vector<1x128xf32> to vector<128x128xf32>
    %13 = arith.addf %10, %12 : vector<128x128xf32>
    %14 = arith.addf %6, %13 : vector<128x128xf32>
    %cst = arith.constant 0.000000e+00 : f32
    %15 = vector.broadcast %cst : f32 to vector<128x128xf32>
    %16 = arith.maximumf %14, %15 : vector<128x128xf32>
    %c0_11 = arith.constant 0 : index
    %c0_12 = arith.constant 0 : index
    %17 = vector.load %arg7[%c0_11, %c0_12] : memref<128x128xf32, #tpu.memory_space<vmem>>, vector<128x128xf32>
    tpu.vector_store %arg7[%c0_11, %c0_12], %16 {strides = array<i32>} : memref<128x128xf32, #tpu.memory_space<vmem>>, vector<128x128xf32>,
    return
  }
  func.func @transform_0(%arg0: i32) -> (i32, i32) {
    %c0_i32 = arith.constant 0 : i32
    %c0_i32_0 = arith.constant 0 : i32
    return %arg0, %c0_i32 : i32, i32
  }
  func.func @transform_1(%arg0: i32) -> (i32, i32) {
    %c0_i32 = arith.constant 0 : i32
    %c0_i32_0 = arith.constant 0 : i32
    %c0_i32_1 = arith.constant 0 : i32
    return %c0_i32, %c0_i32_0 : i32, i32
  }
  func.func @transform_2(%arg0: i32) -> (i32, i32) {
    %c0_i32 = arith.constant 0 : i32
    %c0_i32_0 = arith.constant 0 : i32
    %c0_i32_1 = arith.constant 0 : i32
    return %c0_i32, %c0_i32_0 : i32, i32
  }
  func.func @transform_3(%arg0: i32) -> (i32, i32) {
    %c0_i32 = arith.constant 0 : i32
    %c0_i32_0 = arith.constant 0 : i32
    return %arg0, %c0_i32 : i32, i32
  }
  func.func @transform_4(%arg0: i32) -> (i32, i32) {
    %c0_i32 = arith.constant 0 : i32
    %c0_i32_0 = arith.constant 0 : i32
    %c0_i32_1 = arith.constant 0 : i32
    return %c0_i32, %c0_i32_0 : i32, i32
  }
  func.func @transform_5(%arg0: i32) -> (i32, i32) {
    %c0_i32 = arith.constant 0 : i32
    %c0_i32_0 = arith.constant 0 : i32
    %c0_i32_1 = arith.constant 0 : i32
    return %c0_i32, %c0_i32_0 : i32, i32
  }
  func.func @transform_6(%arg0: i32) -> (i32, i32) {
    %c0_i32 = arith.constant 0 : i32
    %c0_i32_0 = arith.constant 0 : i32
    return %arg0, %c0_i32 : i32, i32
  }
}

</mosaic_0001>

<bundles_post_ra>
// kernel: basic_block_forward.6
= control target key start
LH: loop header
LB: loop body
LE: loop exit
PB: predicated region body
PF: predicated region fallthrough
CT: control target
= control target key end

     0   :  { %s373_s12 = smov 0   ;;  %s468_s0 = inlined_call_operand.vmem [shape: f32[512,128], index: 0, kind: input, shape index: {}]   ;;  %s469_s1 = inlined_call_operand.vmem [shape: f32[1,128], index: 1, kind: input, shape index: {}]   ;;  %s470_s2 = inlined_call_operand.vmem [shape: f32[1,128], index: 2, kind: input, shape index: {}]   ;;  %s471_s3 = inlined_call_operand.vmem [shape: f32[512,128], index: 3, kind: output, shape index: {}]  }
   0x1 LB: > { %s324_s13 = sadd.s32 4294967295, %s351_s12   ;;  %p328_p0 = scmp.ge.s32.totalorder %s351_s12, 1  ;;  %s351_s12 = sphi %s373_s12, %s13_s12  }
   0x2   : > { %p138_p1 = scmp.lt.s32.totalorder %s351_s12, 5 }
   0x4   : > { %p139_p2 = pnand %p328_p0, %p138_p1 }
   0x5   : > { %s329_s14 = sshll.u32 (!%p139_p2), %s324_s13, 4 }
   0x6   : > { %142 = sbr.rel (%p139_p2) target bundleno = 32 (0x20), region = 32  ;;  %p163_p3 = scmp.lt.s32.totalorder (!%p139_p2), %s329_s14, 63 }
   0xb   : > { %s473_s14 = smov (!%p163_p3, %s329_s14), 63  ;;  %v384_v0 = vld [vmem:[%s469_s1] ss:$0 sm:$0xff] }
   0xc   : > { %s330_s15 = sshll.u32 %s473_s14, 3  ;;  %v394_v1 = vld [vmem:[%s470_s2] ss:$0 sm:$0xff] }
   0xd   : > { %s389_s20 = scalar_lea.vmem %s468_s0, %s330_s15  ;;  %s417_s25 = scalar_lea.vmem %s471_s3, %s330_s15 }
   0xe   : > { %v174_v2 = vld [vmem:[%s389_s20] sm:$0xff]  ;;  %v175_v3 = vld [vmem:[%s389_s20 + $0x8] sm:$0xff]  ;;  %v176_v4 = vld [vmem:[%s389_s20 + $0x10] sm:$0xff] }
   0xf   : > { %v197_v5 = vmul.f32 %v384_v0, %v174_v2  ;;  %v198_v6 = vmul.f32 %v384_v0, %v175_v3  ;;  %v199_v7 = vmul.f32 %v384_v0, %v176_v4  ;;  %v177_v8 = vld [vmem:[%s389_s20 + $0x18] sm:$0xff]  ;;  %v178_v9 = vld [vmem:[%s389_s20 + $0x20] sm:$0xff]  ;;  %v179_v10 = vld [vmem:[%s389_s20 + $0x28] sm:$0xff] }
  0x10   : > { %v200_v11 = vmul.f32 %v384_v0, %v177_v8  ;;  %v201_v12 = vmul.f32 %v384_v0, %v178_v9  ;;  %v202_v13 = vmul.f32 %v384_v0, %v179_v10  ;;  %v180_v14 = vld [vmem:[%s389_s20 + $0x30] sm:$0xff]  ;;  %v181_v15 = vld [vmem:[%s389_s20 + $0x38] sm:$0xff]  ;;  %v182_v24 = vld [vmem:[%s389_s20 + $0x40] sm:$0xff] }
  0x11   : > { %v220_v16 = vadd.f32 %v394_v1, %v197_v5  ;;  %v221_v17 = vadd.f32 %v394_v1, %v198_v6  ;;  %v222_v18 = vadd.f32 %v394_v1, %v199_v7  ;;  %v203_v19 = vmul.f32 %v384_v0, %v180_v14  ;;  %v183_v25 = vld [vmem:[%s389_s20 + $0x48] sm:$0xff]  ;;  %v184_v26 = vld [vmem:[%s389_s20 + $0x50] sm:$0xff]  ;;  %v185_v31 = vld [vmem:[%s389_s20 + $0x58] sm:$0xff] }
  0x12   : > { %v223_v20 = vadd.f32 %v394_v1, %v200_v11  ;;  %v224_v21 = vadd.f32 %v394_v1, %v201_v12  ;;  %v225_v22 = vadd.f32 %v394_v1, %v202_v13  ;;  %v204_v23 = vmul.f32 %v384_v0, %v181_v15  ;;  %v186_v32 = vld [vmem:[%s389_s20 + $0x60] sm:$0xff]  ;;  %v187_v33 = vld [vmem:[%s389_s20 + $0x68] sm:$0xff]  ;;  %v188_v38 = vld [vmem:[%s389_s20 + $0x70] sm:$0xff] }
  0x13   : > { %v236_v27 = vmax.f32 %v220_v16, 0.0  ;;  %v237_v28 = vmax.f32 %v221_v17, 0.0  ;;  %v238_v29 = vmax.f32 %v222_v18, 0.0  ;;  %v226_v30 = vadd.f32 %v394_v1, %v203_v19  ;;  %v189_v43 = vld [vmem:[%s389_s20 + $0x78] sm:$0xff] }
  0x14   : > { %v239_v34 = vmax.f32 %v223_v20, 0.0  ;;  %v240_v35 = vmax.f32 %v224_v21, 0.0  ;;  %v241_v36 = vmax.f32 %v225_v22, 0.0  ;;  %v227_v37 = vadd.f32 %v394_v1, %v204_v23 }
  0x15   : > { %252 = vst [vmem:[%s417_s25] sm:$0xff] %v236_v27  ;;  %253 = vst [vmem:[%s417_s25 + $0x8] sm:$0xff] %v237_v28  ;;  %v242_v39 = vmax.f32 %v226_v30, 0.0  ;;  %v205_v40 = vmul.f32 %v384_v0, %v182_v24  ;;  %v206_v41 = vmul.f32 %v384_v0, %v183_v25  ;;  %v207_v42 = vmul.f32 %v384_v0, %v184_v26 }
  0x16   : > { %254 = vst [vmem:[%s417_s25 + $0x10] sm:$0xff] %v238_v29  ;;  %255 = vst [vmem:[%s417_s25 + $0x18] sm:$0xff] %v239_v34  ;;  %v243_v44 = vmax.f32 %v227_v37, 0.0  ;;  %v208_v45 = vmul.f32 %v384_v0, %v185_v31  ;;  %v209_v46 = vmul.f32 %v384_v0, %v186_v32  ;;  %v210_v47 = vmul.f32 %v384_v0, %v187_v33 }
  0x17   : > { %256 = vst [vmem:[%s417_s25 + $0x20] sm:$0xff] %v240_v35  ;;  %257 = vst [vmem:[%s417_s25 + $0x28] sm:$0xff] %v241_v36  ;;  %v228_v48 = vadd.f32 %v394_v1, %v205_v40  ;;  %v229_v49 = vadd.f32 %v394_v1, %v206_v41  ;;  %v230_v50 = vadd.f32 %v394_v1, %v207_v42 }
  0x18   : > { %258 = vst [vmem:[%s417_s25 + $0x30] sm:$0xff] %v242_v39  ;;  %v211_v51 = vmul.f32 %v384_v0, %v188_v38  ;;  %259 = vst [vmem:[%s417_s25 + $0x38] sm:$0xff] %v243_v44  ;;  %v231_v52 = vadd.f32 %v394_v1, %v208_v45  ;;  %v232_v53 = vadd.f32 %v394_v1, %v209_v46 }
  0x19   : > { %v233_v54 = vadd.f32 %v394_v1, %v210_v47  ;;  %v212_v55 = vmul.f32 %v384_v0, %v189_v43  ;;  %v244_v56 = vmax.f32 %v228_v48, 0.0  ;;  %v245_v57 = vmax.f32 %v229_v49, 0.0 }
  0x1a   : > { %v246_v58 = vmax.f32 %v230_v50, 0.0  ;;  %v234_v59 = vadd.f32 %v394_v1, %v211_v51  ;;  %v247_v60 = vmax.f32 %v231_v52, 0.0  ;;  %v248_v61 = vmax.f32 %v232_v53, 0.0 }
  0x1b   : > { %v249_v62 = vmax.f32 %v233_v54, 0.0  ;;  %v235_v63 = vadd.f32 %v394_v1, %v212_v55  ;;  %260 = vst [vmem:[%s417_s25 + $0x40] sm:$0xff] %v244_v56  ;;  %261 = vst [vmem:[%s417_s25 + $0x48] sm:$0xff] %v245_v57 }
  0x1c   : > { %262 = vst [vmem:[%s417_s25 + $0x50] sm:$0xff] %v246_v58  ;;  %v250_v2 = vmax.f32 %v234_v59, 0.0  ;;  %263 = vst [vmem:[%s417_s25 + $0x58] sm:$0xff] %v247_v60 }
  0x1d   : > { %264 = vst [vmem:[%s417_s25 + $0x60] sm:$0xff] %v248_v61  ;;  %265 = vst [vmem:[%s417_s25 + $0x68] sm:$0xff] %v249_v62  ;;  %v251_v0 = vmax.f32 %v235_v63, 0.0 }
  0x1e   : > { %266 = vst [vmem:[%s417_s25 + $0x70] sm:$0xff] %v250_v2 }
  0x1f   : > { %267 = vst [vmem:[%s417_s25 + $0x78] sm:$0xff] %v251_v0 }
  0x20 PF: > { %s13_s12 = sadd.s32 1, %s351_s12  }
  0x21   : > { %p10_p4 = scmp.ge.s32.totalorder %s13_s12, 6  }
  0x23   :  { %12 = sbr.rel (!%p10_p4) target bundleno = 1 (0x1), region = 62 }

// kernel: basic_block_forward.5
= control target key start
LH: loop header
LB: loop body
LE: loop exit
PB: predicated region body
PF: predicated region fallthrough
CT: control target
= control target key end

     0   :  { %s744_s15 = smov 0   ;;  %s807_s0 = inlined_call_operand.vmem [shape: bf16[512,36], index: 0, kind: input, shape index: {}]   ;;  %s808_s1 = inlined_call_operand.vmem [shape: bf16[36,128], index: 1, kind: input, shape index: {}]   ;;  %s809_s2 = inlined_call_operand.vmem [shape: f32[512,128], index: 2, kind: output, shape index: {0}]   ;;  %s810_s3 = inlined_call_operand.vmem [shape: f32[4,8,128], index: 3, kind: output, shape index: {1}]   ;;  %s811_s4 = inlined_call_operand.vmem [shape: f32[4,8,128], index: 4, kind: output, shape index: {2}]  }
   0x1 LB: > { %s750_s16 = sadd.s32 4294967295, %s717_s15   ;;  %p623_p0 = scmp.ge.s32.totalorder %s717_s15, 1  ;;  %s717_s15 = sphi %s744_s15, %s15_s15  }
   0x2   : > { %p168_p1 = scmp.lt.s32.totalorder %s717_s15, 5 }
   0x4   : > { %p169_p2 = pnand %p623_p0, %p168_p1 }
   0x5   : > { %s624_s21 = sshll.u32 (!%p169_p2), %s750_s16, 4  ;;  %p214_p4 = scmp.lt.s32.totalorder (!%p169_p2), %s750_s16, 3 }
   0x6   : > { %172 = sbr.rel (%p169_p2) target bundleno = 268 (0x10c), region = 28  ;;  %p203_p3 = scmp.lt.s32.totalorder (!%p169_p2), %s624_s21, 63 }
   0xb   : > { %v700_v0 = vld [vmem:[%s808_s1 + $0x10] ss:$0 sps:$4 sm:$0x33]   ;;  %vm324_vm0 = vcmask 1041408   ;;  %v701_v1 = vld [vmem:[%s808_s1 + $0x8] sm:$0xff]   ;;  %v702_v3 = vld [vmem:[%s808_s1] sm:$0xff]  }
   0xc   : > { %690 = vmatprep.subr.msk.bf16.mxu0 %vm324_vm0, %v700_v0  ;;  %v326_v2 = vsel %vm324_vm0, %v700_v0, 0  ;;  %691 = vmatprep.subr.msk.bf16.mxu1 %vm324_vm0, %v700_v0  ;;  %s813_s21 = smov (!%p203_p3, %s624_s21), 63  ;;  %vm299_vm1 = vcmask 293888   ;;  %s815_s16 = smov (!%p214_p4, %s750_s16), 3 }
   0xd   : > { %663 = vmatpush3.bf16.msra.mxu0 %v326_v2  ;;  %687 = vmatpush3.bf16.msra.mxu1 %v326_v2  ;;  %s625_s24 = sshll.u32 %s813_s21, 2  ;;  %s627_s28 = sshll.u32 %s813_s21, 3 }
   0xe   : > { %664 = vmatprep.subr.bf16.mxu0 %v701_v1  ;;  %685 = vmatprep.subr.bf16.mxu1 %v701_v1  ;;  %s206_s27 = scalar_lea.vmem %s807_s0, %s625_s24  ;;  %s778_s5 = scalar_lea.vmem %s809_s2, %s627_s28 }
   0xf   : > { %v703_v4 = vld [vmem:[%s206_s27] sm:$0xff]   ;;  %v704_v5 = vld [vmem:[%s206_s27 + $0x8] sm:$0xff]   ;;  %v705_v6 = vld [vmem:[%s206_s27 + $0x10] sm:$0xff]   ;;  %s628_s6 = sshll.u32 %s815_s16, 3 }
  0x10   : > { %668 = vmatprep.mubr.msk.bf16.mxu0 %vm299_vm1, %v703_v4  ;;  %v707_v7 = vld [vmem:[%s206_s27 + $0x20] sm:$0xff]   ;;  %v708_v8 = vld [vmem:[%s206_s27 + $0x28] sm:$0xff]   ;;  %v709_v9 = vld [vmem:[%s206_s27 + $0x30] sm:$0xff]   ;;  %s217_s9 = scalar_lea.vmem %s810_s3, %s628_s6  ;;  %s221_s12 = scalar_lea.vmem %s811_s4, %s628_s6 }
  0x11   : > { %665 = vmatpush3.bf16.msra.mxu0 %v701_v1  ;;  %688 = vmatpush3.bf16.msra.mxu1 %v701_v1  ;;  %v706_v10 = vld [vmem:[%s206_s27 + $0x18] sm:$0xff]  }
  0x12   : > { %666 = vmatprep.subr.bf16.mxu0 %v702_v3  ;;  %686 = vmatprep.subr.bf16.mxu1 %v702_v3  ;;  %v710_v11 = vld [vmem:[%s206_s27 + $0x38] sm:$0xff]  }
  0x13   : > { %676 = vmatprep.mubr.msk.bf16.mxu1 %vm299_vm1, %v707_v7 }
  0x15   : > { %667 = vmatpush3.bf16.msra.mxu0 %v702_v3  ;;  %689 = vmatpush3.bf16.msra.mxu1 %v702_v3 }
  0x18   : > { %669 = vmatmul.mubr.msk.bf16.vlgmr.msra.gmra.mxu0 %vm299_vm1, %v704_v5  ;;  %677 = vmatmul.mubr.msk.bf16.vlgmr.msra.gmra.mxu1 %vm299_vm1, %v708_v8 }
  0x19   : > { %672 = vmatprep.mubr.msk.bf16.mxu0 %vm299_vm1, %v705_v6  ;;  %680 = vmatprep.mubr.msk.bf16.mxu1 %vm299_vm1, %v709_v9 }
  0x20   : > { %673 = vmatmul.mubr.msk.bf16.gmra.mxu0 %vm299_vm1, %v706_v10  ;;  %681 = vmatmul.mubr.msk.bf16.gmra.mxu1 %vm299_vm1, %v710_v11 }
  0xd8   : > { %v670_v12 = vpop.f32.mrf.mxu0  ;;  %v678_v14 = vpop.f32.mrf.mxu1 }
  0xd9   : > { %427 = vst [vmem:[%s778_s5 + $0x10] sm:$0xff] %v670_v12  ;;  %435 = vst [vmem:[%s778_s5 + $0x50] sm:$0xff] %v678_v14  ;;  %v464_v24 = vmul.f32 %v670_v12, %v670_v12  ;;  %v472_v55 = vmul.f32 %v678_v14, %v678_v14 }
  0xda   : > { %v362_v13 = vpop.f32.mrf.mxu0  ;;  %v394_v16 = vpop.f32.mrf.mxu1 }
  0xdb   : > { %425 = vst [vmem:[%s778_s5] sm:$0xff] %v362_v13  ;;  %433 = vst [vmem:[%s778_s5 + $0x40] sm:$0xff] %v394_v16  ;;  %v462_v19 = vmul.f32 %v362_v13, %v362_v13  ;;  %v470_v49 = vmul.f32 %v394_v16, %v394_v16 }
  0xdc   : > { %v671_v15 = vpop.f32.mrf.mxu0  ;;  %v679_v18 = vpop.f32.mrf.mxu1 }
  0xdd   : > { %428 = vst [vmem:[%s778_s5 + $0x18] sm:$0xff] %v671_v15  ;;  %436 = vst [vmem:[%s778_s5 + $0x58] sm:$0xff] %v679_v18  ;;  %v465_v29 = vmul.f32 %v671_v15, %v671_v15  ;;  %v473_v58 = vmul.f32 %v679_v18, %v679_v18 }
  0xde   : > { %v365_v17 = vpop.f32.mrf.mxu0  ;;  %v397_v23 = vpop.f32.mrf.mxu1 }
  0xdf   : > { %426 = vst [vmem:[%s778_s5 + $0x8] sm:$0xff] %v365_v17  ;;  %v441_v20 = vadd.f32 %v365_v17, %v362_v13  ;;  %v463_v21 = vmul.f32 %v365_v17, %v365_v17  ;;  %434 = vst [vmem:[%s778_s5 + $0x48] sm:$0xff] %v397_v23  ;;  %v471_v53 = vmul.f32 %v397_v23, %v397_v23 }
  0xe0   : > { %v674_v22 = vpop.f32.mrf.mxu0  ;;  %v682_v28 = vpop.f32.mrf.mxu1 }
  0xe1   : > { %v442_v25 = vadd.f32 %v670_v12, %v441_v20  ;;  %v478_v26 = vadd.f32 %v463_v21, %v462_v19  ;;  %431 = vst [vmem:[%s778_s5 + $0x30] sm:$0xff] %v674_v22  ;;  %439 = vst [vmem:[%s778_s5 + $0x70] sm:$0xff] %v682_v28  ;;  %v468_v43 = vmul.f32 %v674_v22, %v674_v22 }
  0xe2   : > { %v378_v27 = vpop.f32.mrf.mxu0  ;;  %v410_v33 = vpop.f32.mrf.mxu1  ;;  %v476_v3 = vmul.f32 %v682_v28, %v682_v28 }
  0xe3   : > { %v479_v30 = vadd.f32 %v478_v26, %v464_v24  ;;  %429 = vst [vmem:[%s778_s5 + $0x20] sm:$0xff] %v378_v27  ;;  %v443_v31 = vadd.f32 %v671_v15, %v442_v25  ;;  %v466_v35 = vmul.f32 %v378_v27, %v378_v27  ;;  %437 = vst [vmem:[%s778_s5 + $0x60] sm:$0xff] %v410_v33 }
  0xe4   : > { %v675_v32 = vpop.f32.mrf.mxu0  ;;  %v683_v38 = vpop.f32.mrf.mxu1  ;;  %v474_v62 = vmul.f32 %v410_v33, %v410_v33 }
  0xe5   : > { %v444_v34 = vadd.f32 %v443_v31, %v378_v27  ;;  %v480_v36 = vadd.f32 %v479_v30, %v465_v29  ;;  %432 = vst [vmem:[%s778_s5 + $0x38] sm:$0xff] %v675_v32  ;;  %440 = vst [vmem:[%s778_s5 + $0x78] sm:$0xff] %v683_v38  ;;  %v469_v46 = vmul.f32 %v675_v32, %v675_v32 }
  0xe6   : > { %v381_v37 = vpop.f32.mrf.mxu0  ;;  %v413_v42 = vpop.f32.mrf.mxu1  ;;  %v477_v6 = vmul.f32 %v683_v38, %v683_v38 }
  0xe7   : > { %v481_v39 = vadd.f32 %v480_v36, %v466_v35  ;;  %430 = vst [vmem:[%s778_s5 + $0x28] sm:$0xff] %v381_v37  ;;  %v445_v40 = vadd.f32 %v444_v34, %v381_v37  ;;  %v467_v41 = vmul.f32 %v381_v37, %v381_v37  ;;  %438 = vst [vmem:[%s778_s5 + $0x68] sm:$0xff] %v413_v42 }
  0xe8   : > { %v475_v2 = vmul.f32 %v413_v42, %v413_v42 }
  0xe9   : > { %v446_v44 = vadd.f32 %v674_v22, %v445_v40  ;;  %v482_v45 = vadd.f32 %v481_v39, %v467_v41 }
  0xeb   : > { %v447_v47 = vadd.f32 %v675_v32, %v446_v44  ;;  %v483_v48 = vadd.f32 %v482_v45, %v468_v43 }
  0xed   : > { %v484_v50 = vadd.f32 %v483_v48, %v469_v46  ;;  %v448_v51 = vadd.f32 %v447_v47, %v394_v16 }
  0xef   : > { %v449_v52 = vadd.f32 %v448_v51, %v397_v23  ;;  %v485_v54 = vadd.f32 %v484_v50, %v470_v49 }
  0xf1   : > { %v450_v56 = vadd.f32 %v678_v14, %v449_v52  ;;  %v486_v57 = vadd.f32 %v485_v54, %v471_v53 }
  0xf3   : > { %v487_v59 = vadd.f32 %v486_v57, %v472_v55  ;;  %v451_v60 = vadd.f32 %v679_v18, %v450_v56 }
  0xf5   : > { %v452_v61 = vadd.f32 %v451_v60, %v410_v33  ;;  %v488_v63 = vadd.f32 %v487_v59, %v473_v58 }
  0xf7   : > { %v489_v0 = vadd.f32 %v488_v63, %v474_v62  ;;  %v453_v1 = vadd.f32 %v452_v61, %v413_v42 }
  0xf9   : > { %v454_v4 = vadd.f32 %v682_v28, %v453_v1  ;;  %v490_v5 = vadd.f32 %v489_v0, %v475_v2 }
  0xfb   : > { %v455_v7 = vadd.f32 %v683_v38, %v454_v4  ;;  %v491_v8 = vadd.f32 %v490_v5, %v476_v3 }
  0xfd   : > { %v456_v9 = vrot.slane %v455_v7, 4  ;;  %v492_v10 = vadd.f32 %v491_v8, %v477_v6 }
  0xff   : > { %v457_v11 = vadd.f32 %v456_v9, %v455_v7  ;;  %v493_v12 = vrot.slane %v492_v10, 4 }
 0x101   : > { %v458_v13 = vrot.slane %v457_v11, 2  ;;  %v494_v14 = vadd.f32 %v493_v12, %v492_v10 }
 0x103   : > { %v459_v15 = vadd.f32 %v458_v13, %v457_v11  ;;  %v495_v16 = vrot.slane %v494_v14, 2 }
 0x105   : > { %v460_v17 = vrot.slane %v459_v15, 1  ;;  %v496_v18 = vadd.f32 %v495_v16, %v494_v14 }
 0x107   : > { %v461_v19 = vadd.f32 %v460_v17, %v459_v15  ;;  %v497_v20 = vrot.slane %v496_v18, 1 }
 0x109   : > { %v498_v21 = vadd.f32 %v497_v20, %v496_v18  ;;  %499 = vst [vmem:[%s217_s9] sm:$0xff] %v461_v19 }
 0x10b   : > { %500 = vst [vmem:[%s221_s12] sm:$0xff] %v498_v21 }
 0x10c PF: > { %s15_s15 = sadd.s32 1, %s717_s15  }
 0x10d   : > { %p12_p5 = scmp.ge.s32.totalorder %s15_s15, 6  }
 0x10f   :  { %14 = sbr.rel (!%p12_p5) target bundleno = 1 (0x1), region = 82 }

// kernel: basic_block_forward.8
= control target key start
LH: loop header
LB: loop body
LE: loop exit
PB: predicated region body
PF: predicated region fallthrough
CT: control target
= control target key end

     0   :  { %s774_s15 = smov 0   ;;  %s847_s0 = inlined_call_operand.vmem [shape: bf16[512,72], index: 0, kind: input, shape index: {}]   ;;  %s848_s1 = inlined_call_operand.vmem [shape: bf16[72,128], index: 1, kind: input, shape index: {}]   ;;  %s849_s2 = inlined_call_operand.vmem [shape: f32[512,128], index: 2, kind: output, shape index: {0}]   ;;  %s850_s3 = inlined_call_operand.vmem [shape: f32[4,8,128], index: 3, kind: output, shape index: {1}]   ;;  %s851_s4 = inlined_call_operand.vmem [shape: f32[4,8,128], index: 4, kind: output, shape index: {2}]  }
   0x1 LB: > { %s780_s16 = sadd.s32 4294967295, %s747_s15   ;;  %p639_p0 = scmp.ge.s32.totalorder %s747_s15, 1  ;;  %s747_s15 = sphi %s774_s15, %s15_s15  }
   0x2   : > { %p168_p1 = scmp.lt.s32.totalorder %s747_s15, 5 }
   0x4   : > { %p169_p2 = pnand %p639_p0, %p168_p1 }
   0x5   : > { %s640_s21 = sshll.u32 (!%p169_p2), %s780_s16, 4  ;;  %p214_p4 = scmp.lt.s32.totalorder (!%p169_p2), %s780_s16, 3 }
   0x6   : > { %172 = sbr.rel (%p169_p2) target bundleno = 276 (0x114), region = 28  ;;  %p203_p3 = scmp.lt.s32.totalorder (!%p169_p2), %s640_s21, 63 }
   0xb   : > { %v728_v0 = vld [vmem:[%s848_s1 + $0x20] ss:$0 sps:$4 sm:$0xff]   ;;  %vm340_vm0 = vcmask 1043456   ;;  %v729_v1 = vld [vmem:[%s848_s1 + $0x18] sm:$0xff]   ;;  %v730_v3 = vld [vmem:[%s848_s1 + $0x10] sm:$0xff]   ;;  %s853_s21 = smov (!%p203_p3, %s640_s21), 63 }
   0xc   : > { %718 = vmatprep.subr.msk.bf16.mxu0 %vm340_vm0, %v728_v0  ;;  %v342_v2 = vsel %vm340_vm0, %v728_v0, 0  ;;  %719 = vmatprep.subr.msk.bf16.mxu1 %vm340_vm0, %v728_v0  ;;  %v731_v4 = vld [vmem:[%s848_s1 + $0x8] sm:$0xff]   ;;  %s641_s26 = sshll.u32 %s853_s21, 2  ;;  %vm315_vm1 = vcmask 588800   ;;  %v732_v6 = vld [vmem:[%s848_s1] sm:$0xff]   ;;  %s643_s6 = sshll.u32 %s853_s21, 3 }
   0xd   : > { %683 = vmatpush3.bf16.msra.mxu0 %v342_v2  ;;  %713 = vmatpush3.bf16.msra.mxu1 %v342_v2  ;;  %s206_s29 = scalar_lea.vmem %s847_s0, %s641_s26  ;;  %s818_s9 = scalar_lea.vmem %s849_s2, %s643_s6 }
   0xe   : > { %684 = vmatprep.subr.bf16.mxu0 %v729_v1  ;;  %709 = vmatprep.subr.bf16.mxu1 %v729_v1  ;;  %v733_v5 = vld [vmem:[%s206_s29] sm:$0xff]   ;;  %v734_v8 = vld [vmem:[%s206_s29 + $0x8] sm:$0xff]   ;;  %v735_v10 = vld [vmem:[%s206_s29 + $0x10] sm:$0xff]   ;;  %s855_s16 = smov (!%p214_p4, %s780_s16), 3 }
   0xf   : > { %692 = vmatprep.mubr.msk.bf16.mxu0 %vm315_vm1, %v733_v5  ;;  %v737_v7 = vld [vmem:[%s206_s29 + $0x20] sm:$0xff]   ;;  %v738_v9 = vld [vmem:[%s206_s29 + $0x28] sm:$0xff]   ;;  %v739_v11 = vld [vmem:[%s206_s29 + $0x30] sm:$0xff]   ;;  %s644_s10 = sshll.u32 %s855_s16, 3 }
  0x10   : > { %700 = vmatprep.mubr.msk.bf16.mxu1 %vm315_vm1, %v737_v7  ;;  %v736_v12 = vld [vmem:[%s206_s29 + $0x18] sm:$0xff]   ;;  %s217_s13 = scalar_lea.vmem %s850_s3, %s644_s10  ;;  %s221_s18 = scalar_lea.vmem %s851_s4, %s644_s10 }
  0x11   : > { %685 = vmatpush3.bf16.msra.mxu0 %v729_v1  ;;  %714 = vmatpush3.bf16.msra.mxu1 %v729_v1  ;;  %v740_v13 = vld [vmem:[%s206_s29 + $0x38] sm:$0xff]  }
  0x12   : > { %686 = vmatprep.subr.bf16.mxu0 %v730_v3  ;;  %710 = vmatprep.subr.bf16.mxu1 %v730_v3 }
  0x15   : > { %687 = vmatpush3.bf16.msra.mxu0 %v730_v3  ;;  %715 = vmatpush3.bf16.msra.mxu1 %v730_v3 }
  0x16   : > { %688 = vmatprep.subr.bf16.mxu0 %v731_v4  ;;  %711 = vmatprep.subr.bf16.mxu1 %v731_v4 }
  0x19   : > { %689 = vmatpush3.bf16.msra.mxu0 %v731_v4  ;;  %716 = vmatpush3.bf16.msra.mxu1 %v731_v4 }
  0x1a   : > { %690 = vmatprep.subr.bf16.mxu0 %v732_v6  ;;  %712 = vmatprep.subr.bf16.mxu1 %v732_v6 }
  0x1d   : > { %691 = vmatpush3.bf16.msra.mxu0 %v732_v6  ;;  %717 = vmatpush3.bf16.msra.mxu1 %v732_v6 }
  0x20   : > { %693 = vmatmul.mubr.msk.bf16.vlgmr.msra.gmra.mxu0 %vm315_vm1, %v734_v8  ;;  %701 = vmatmul.mubr.msk.bf16.vlgmr.msra.gmra.mxu1 %vm315_vm1, %v738_v9 }
  0x21   : > { %696 = vmatprep.mubr.msk.bf16.mxu0 %vm315_vm1, %v735_v10  ;;  %704 = vmatprep.mubr.msk.bf16.mxu1 %vm315_vm1, %v739_v11 }
  0x28   : > { %697 = vmatmul.mubr.msk.bf16.gmra.mxu0 %vm315_vm1, %v736_v12  ;;  %705 = vmatmul.mubr.msk.bf16.gmra.mxu1 %vm315_vm1, %v740_v13 }
  0xe0   : > { %v694_v14 = vpop.f32.mrf.mxu0  ;;  %v702_v15 = vpop.f32.mrf.mxu1 }
  0xe1   : > { %443 = vst [vmem:[%s818_s9 + $0x10] sm:$0xff] %v694_v14  ;;  %451 = vst [vmem:[%s818_s9 + $0x50] sm:$0xff] %v702_v15  ;;  %v480_v27 = vmul.f32 %v694_v14, %v694_v14  ;;  %v488_v57 = vmul.f32 %v702_v15, %v702_v15 }
  0xe2   : > { %v378_v16 = vpop.f32.mrf.mxu0  ;;  %v410_v17 = vpop.f32.mrf.mxu1 }
  0xe3   : > { %441 = vst [vmem:[%s818_s9] sm:$0xff] %v378_v16  ;;  %449 = vst [vmem:[%s818_s9 + $0x40] sm:$0xff] %v410_v17  ;;  %v478_v22 = vmul.f32 %v378_v16, %v378_v16  ;;  %v486_v51 = vmul.f32 %v410_v17, %v410_v17 }
  0xe4   : > { %v695_v18 = vpop.f32.mrf.mxu0  ;;  %v703_v19 = vpop.f32.mrf.mxu1 }
  0xe5   : > { %444 = vst [vmem:[%s818_s9 + $0x18] sm:$0xff] %v695_v18  ;;  %452 = vst [vmem:[%s818_s9 + $0x58] sm:$0xff] %v703_v19  ;;  %v481_v32 = vmul.f32 %v695_v18, %v695_v18  ;;  %v489_v60 = vmul.f32 %v703_v19, %v703_v19 }
  0xe6   : > { %v381_v20 = vpop.f32.mrf.mxu0  ;;  %v413_v21 = vpop.f32.mrf.mxu1 }
  0xe7   : > { %442 = vst [vmem:[%s818_s9 + $0x8] sm:$0xff] %v381_v20  ;;  %v457_v23 = vadd.f32 %v381_v20, %v378_v16  ;;  %v479_v24 = vmul.f32 %v381_v20, %v381_v20  ;;  %450 = vst [vmem:[%s818_s9 + $0x48] sm:$0xff] %v413_v21  ;;  %v487_v55 = vmul.f32 %v413_v21, %v413_v21 }
  0xe8   : > { %v698_v25 = vpop.f32.mrf.mxu0  ;;  %v706_v26 = vpop.f32.mrf.mxu1 }
  0xe9   : > { %v458_v28 = vadd.f32 %v694_v14, %v457_v23  ;;  %v494_v29 = vadd.f32 %v479_v24, %v478_v22  ;;  %447 = vst [vmem:[%s818_s9 + $0x30] sm:$0xff] %v698_v25  ;;  %455 = vst [vmem:[%s818_s9 + $0x70] sm:$0xff] %v706_v26  ;;  %v484_v45 = vmul.f32 %v698_v25, %v698_v25 }
  0xea   : > { %v394_v30 = vpop.f32.mrf.mxu0  ;;  %v426_v31 = vpop.f32.mrf.mxu1  ;;  %v492_v5 = vmul.f32 %v706_v26, %v706_v26 }
  0xeb   : > { %v495_v33 = vadd.f32 %v494_v29, %v480_v27  ;;  %445 = vst [vmem:[%s818_s9 + $0x20] sm:$0xff] %v394_v30  ;;  %v459_v34 = vadd.f32 %v695_v18, %v458_v28  ;;  %453 = vst [vmem:[%s818_s9 + $0x60] sm:$0xff] %v426_v31  ;;  %v482_v38 = vmul.f32 %v394_v30, %v394_v30 }
  0xec   : > { %v699_v35 = vpop.f32.mrf.mxu0  ;;  %v707_v36 = vpop.f32.mrf.mxu1  ;;  %v490_v0 = vmul.f32 %v426_v31, %v426_v31 }
  0xed   : > { %v460_v37 = vadd.f32 %v459_v34, %v394_v30  ;;  %v496_v39 = vadd.f32 %v495_v33, %v481_v32  ;;  %448 = vst [vmem:[%s818_s9 + $0x38] sm:$0xff] %v699_v35  ;;  %456 = vst [vmem:[%s818_s9 + $0x78] sm:$0xff] %v707_v36  ;;  %v485_v48 = vmul.f32 %v699_v35, %v699_v35 }
  0xee   : > { %v397_v40 = vpop.f32.mrf.mxu0  ;;  %v429_v41 = vpop.f32.mrf.mxu1  ;;  %v493_v8 = vmul.f32 %v707_v36, %v707_v36 }
  0xef   : > { %v497_v42 = vadd.f32 %v496_v39, %v482_v38  ;;  %446 = vst [vmem:[%s818_s9 + $0x28] sm:$0xff] %v397_v40  ;;  %v461_v43 = vadd.f32 %v460_v37, %v397_v40  ;;  %v483_v44 = vmul.f32 %v397_v40, %v397_v40  ;;  %454 = vst [vmem:[%s818_s9 + $0x68] sm:$0xff] %v429_v41 }
  0xf0   : > { %v491_v4 = vmul.f32 %v429_v41, %v429_v41 }
  0xf1   : > { %v462_v46 = vadd.f32 %v698_v25, %v461_v43  ;;  %v498_v47 = vadd.f32 %v497_v42, %v483_v44 }
  0xf3   : > { %v463_v49 = vadd.f32 %v699_v35, %v462_v46  ;;  %v499_v50 = vadd.f32 %v498_v47, %v484_v45 }
  0xf5   : > { %v500_v52 = vadd.f32 %v499_v50, %v485_v48  ;;  %v464_v53 = vadd.f32 %v463_v49, %v410_v17 }
  0xf7   : > { %v465_v54 = vadd.f32 %v464_v53, %v413_v21  ;;  %v501_v56 = vadd.f32 %v500_v52, %v486_v51 }
  0xf9   : > { %v466_v58 = vadd.f32 %v702_v15, %v465_v54  ;;  %v502_v59 = vadd.f32 %v501_v56, %v487_v55 }
  0xfb   : > { %v503_v61 = vadd.f32 %v502_v59, %v488_v57  ;;  %v467_v62 = vadd.f32 %v703_v19, %v466_v58 }
  0xfd   : > { %v468_v63 = vadd.f32 %v467_v62, %v426_v31  ;;  %v504_v1 = vadd.f32 %v503_v61, %v489_v60 }
  0xff   : > { %v505_v2 = vadd.f32 %v504_v1, %v490_v0  ;;  %v469_v3 = vadd.f32 %v468_v63, %v429_v41 }
 0x101   : > { %v470_v6 = vadd.f32 %v706_v26, %v469_v3  ;;  %v506_v7 = vadd.f32 %v505_v2, %v491_v4 }
 0x103   : > { %v471_v9 = vadd.f32 %v707_v36, %v470_v6  ;;  %v507_v10 = vadd.f32 %v506_v7, %v492_v5 }
 0x105   : > { %v472_v11 = vrot.slane %v471_v9, 4  ;;  %v508_v12 = vadd.f32 %v507_v10, %v493_v8 }
 0x107   : > { %v473_v13 = vadd.f32 %v472_v11, %v471_v9  ;;  %v509_v14 = vrot.slane %v508_v12, 4 }
 0x109   : > { %v474_v15 = vrot.slane %v473_v13, 2  ;;  %v510_v16 = vadd.f32 %v509_v14, %v508_v12 }
 0x10b   : > { %v475_v17 = vadd.f32 %v474_v15, %v473_v13  ;;  %v511_v18 = vrot.slane %v510_v16, 2 }
 0x10d   : > { %v476_v19 = vrot.slane %v475_v17, 1  ;;  %v512_v20 = vadd.f32 %v511_v18, %v510_v16 }
 0x10f   : > { %v477_v21 = vadd.f32 %v476_v19, %v475_v17  ;;  %v513_v22 = vrot.slane %v512_v20, 1 }
 0x111   : > { %v514_v23 = vadd.f32 %v513_v22, %v512_v20  ;;  %515 = vst [vmem:[%s217_s13] sm:$0xff] %v477_v21 }
 0x113   : > { %516 = vst [vmem:[%s221_s18] sm:$0xff] %v514_v23 }
 0x114 PF: > { %s15_s15 = sadd.s32 1, %s747_s15  }
 0x115   : > { %p12_p5 = scmp.ge.s32.totalorder %s15_s15, 6  }
 0x117   :  { %14 = sbr.rel (!%p12_p5) target bundleno = 1 (0x1), region = 82 }

// kernel: basic_block_forward.7
= control target key start
LH: loop header
LB: loop body
LE: loop exit
PB: predicated region body
PF: predicated region fallthrough
CT: control target
= control target key end

     0   :  { %s709_s15 = smov 0   ;;  %s766_s0 = inlined_call_operand.vmem [shape: bf16[512,4], index: 0, kind: input, shape index: {}]   ;;  %s767_s1 = inlined_call_operand.vmem [shape: bf16[4,128], index: 1, kind: input, shape index: {}]   ;;  %s768_s2 = inlined_call_operand.vmem [shape: f32[512,128], index: 2, kind: output, shape index: {0}]   ;;  %s769_s3 = inlined_call_operand.vmem [shape: f32[4,8,128], index: 3, kind: output, shape index: {1}]   ;;  %s770_s4 = inlined_call_operand.vmem [shape: f32[4,8,128], index: 4, kind: output, shape index: {2}]  }
   0x1 LB: > { %s715_s16 = sadd.s32 4294967295, %s682_s15   ;;  %p604_p0 = scmp.ge.s32.totalorder %s682_s15, 1  ;;  %s682_s15 = sphi %s709_s15, %s15_s15  }
   0x2   : > { %p168_p1 = scmp.lt.s32.totalorder %s682_s15, 5 }
   0x4   : > { %p169_p2 = pnand %p604_p0, %p168_p1 }
   0x5   : > { %s605_s19 = sshll.u32 (!%p169_p2), %s715_s16, 4  ;;  %p214_p4 = scmp.lt.s32.totalorder (!%p169_p2), %s715_s16, 3 }
   0x6   : > { %172 = sbr.rel (%p169_p2) target bundleno = 260 (0x104), region = 28  ;;  %p203_p3 = scmp.lt.s32.totalorder (!%p169_p2), %s605_s19, 63 }
   0xb   : > { %v239_v0 = vld [vmem:[%s767_s1] sm:$0x3]  ;;  %vm305_vm0 = vcmask 1041408   ;;  %s772_s19 = smov (!%p203_p3, %s605_s19), 63  ;;  %vm280_vm1 = vcmask 31744   ;;  %s774_s16 = smov (!%p214_p4, %s715_s16), 3 }
   0xc   : > { %658 = vmatprep.subr.msk.bf16.mxu0 %vm305_vm0, %v239_v0  ;;  %v307_v1 = vsel %vm305_vm0, %v239_v0, 0  ;;  %659 = vmatprep.subr.msk.bf16.mxu1 %vm305_vm0, %v239_v0  ;;  %s606_s20 = sshll.u32 %s772_s19, 2  ;;  %s608_s24 = sshll.u32 %s772_s19, 3 }
   0xd   : > { %639 = vmatpush3.bf16.msra.mxu0 %v307_v1  ;;  %657 = vmatpush3.bf16.msra.mxu1 %v307_v1  ;;  %s206_s23 = scalar_lea.vmem %s766_s0, %s606_s20  ;;  %s737_s27 = scalar_lea.vmem %s768_s2, %s608_s24 }
   0xe   : > { %v668_v2 = vld [vmem:[%s206_s23] sm:$0xff]   ;;  %v669_v3 = vld [vmem:[%s206_s23 + $0x8] sm:$0xff]   ;;  %v670_v4 = vld [vmem:[%s206_s23 + $0x10] sm:$0xff]   ;;  %s609_s28 = sshll.u32 %s774_s16, 3 }
   0xf   : > { %640 = vmatprep.mubr.msk.bf16.mxu0 %vm280_vm1, %v668_v2  ;;  %v672_v5 = vld [vmem:[%s206_s23 + $0x20] sm:$0xff]   ;;  %v673_v6 = vld [vmem:[%s206_s23 + $0x28] sm:$0xff]   ;;  %v674_v7 = vld [vmem:[%s206_s23 + $0x30] sm:$0xff]   ;;  %s217_s5 = scalar_lea.vmem %s769_s3, %s609_s28  ;;  %s221_s8 = scalar_lea.vmem %s770_s4, %s609_s28 }
  0x10   : > { %641 = vmatmul.mubr.msk.bf16.vlgmr.msra.gmra.mxu0 %vm280_vm1, %v669_v3  ;;  %648 = vmatprep.mubr.msk.bf16.mxu1 %vm280_vm1, %v672_v5  ;;  %v671_v8 = vld [vmem:[%s206_s23 + $0x18] sm:$0xff]  }
  0x11   : > { %644 = vmatprep.mubr.msk.bf16.mxu0 %vm280_vm1, %v670_v4  ;;  %649 = vmatmul.mubr.msk.bf16.vlgmr.msra.gmra.mxu1 %vm280_vm1, %v673_v6  ;;  %v675_v9 = vld [vmem:[%s206_s23 + $0x38] sm:$0xff]  }
  0x12   : > { %652 = vmatprep.mubr.msk.bf16.mxu1 %vm280_vm1, %v674_v7 }
  0x18   : > { %645 = vmatmul.mubr.msk.bf16.gmra.mxu0 %vm280_vm1, %v671_v8 }
  0x19   : > { %653 = vmatmul.mubr.msk.bf16.gmra.mxu1 %vm280_vm1, %v675_v9 }
  0xd0   : > { %v642_v10 = vpop.f32.mrf.mxu0 }
  0xd1   : > { %408 = vst [vmem:[%s737_s27 + $0x10] sm:$0xff] %v642_v10  ;;  %v650_v13 = vpop.f32.mrf.mxu1  ;;  %v445_v21 = vmul.f32 %v642_v10, %v642_v10 }
  0xd2   : > { %v343_v11 = vpop.f32.mrf.mxu0  ;;  %416 = vst [vmem:[%s737_s27 + $0x50] sm:$0xff] %v650_v13  ;;  %v453_v53 = vmul.f32 %v650_v13, %v650_v13 }
  0xd3   : > { %406 = vst [vmem:[%s737_s27] sm:$0xff] %v343_v11  ;;  %v375_v15 = vpop.f32.mrf.mxu1  ;;  %v443_v16 = vmul.f32 %v343_v11, %v343_v11 }
  0xd4   : > { %v643_v12 = vpop.f32.mrf.mxu0  ;;  %414 = vst [vmem:[%s737_s27 + $0x40] sm:$0xff] %v375_v15  ;;  %v451_v47 = vmul.f32 %v375_v15, %v375_v15 }
  0xd5   : > { %409 = vst [vmem:[%s737_s27 + $0x18] sm:$0xff] %v643_v12  ;;  %v651_v20 = vpop.f32.mrf.mxu1  ;;  %v446_v26 = vmul.f32 %v643_v12, %v643_v12 }
  0xd6   : > { %v346_v14 = vpop.f32.mrf.mxu0  ;;  %417 = vst [vmem:[%s737_s27 + $0x58] sm:$0xff] %v651_v20  ;;  %v454_v56 = vmul.f32 %v651_v20, %v651_v20 }
  0xd7   : > { %407 = vst [vmem:[%s737_s27 + $0x8] sm:$0xff] %v346_v14  ;;  %v422_v17 = vadd.f32 %v346_v14, %v343_v11  ;;  %v444_v18 = vmul.f32 %v346_v14, %v346_v14  ;;  %v378_v25 = vpop.f32.mrf.mxu1 }
  0xd8   : > { %v646_v19 = vpop.f32.mrf.mxu0  ;;  %415 = vst [vmem:[%s737_s27 + $0x48] sm:$0xff] %v378_v25  ;;  %v452_v51 = vmul.f32 %v378_v25, %v378_v25 }
  0xd9   : > { %v423_v22 = vadd.f32 %v642_v10, %v422_v17  ;;  %v459_v23 = vadd.f32 %v444_v18, %v443_v16  ;;  %412 = vst [vmem:[%s737_s27 + $0x30] sm:$0xff] %v646_v19  ;;  %v654_v30 = vpop.f32.mrf.mxu1  ;;  %v449_v40 = vmul.f32 %v646_v19, %v646_v19 }
  0xda   : > { %v359_v24 = vpop.f32.mrf.mxu0  ;;  %420 = vst [vmem:[%s737_s27 + $0x70] sm:$0xff] %v654_v30  ;;  %v457_v1 = vmul.f32 %v654_v30, %v654_v30 }
  0xdb   : > { %v460_v27 = vadd.f32 %v459_v23, %v445_v21  ;;  %410 = vst [vmem:[%s737_s27 + $0x20] sm:$0xff] %v359_v24  ;;  %v424_v28 = vadd.f32 %v643_v12, %v423_v22  ;;  %v447_v32 = vmul.f32 %v359_v24, %v359_v24  ;;  %v391_v35 = vpop.f32.mrf.mxu1 }
  0xdc   : > { %v647_v29 = vpop.f32.mrf.mxu0  ;;  %418 = vst [vmem:[%s737_s27 + $0x60] sm:$0xff] %v391_v35  ;;  %v455_v60 = vmul.f32 %v391_v35, %v391_v35 }
  0xdd   : > { %v425_v31 = vadd.f32 %v424_v28, %v359_v24  ;;  %v461_v33 = vadd.f32 %v460_v27, %v446_v26  ;;  %413 = vst [vmem:[%s737_s27 + $0x38] sm:$0xff] %v647_v29  ;;  %v655_v39 = vpop.f32.mrf.mxu1  ;;  %v450_v44 = vmul.f32 %v647_v29, %v647_v29 }
  0xde   : > { %v362_v34 = vpop.f32.mrf.mxu0  ;;  %421 = vst [vmem:[%s737_s27 + $0x78] sm:$0xff] %v655_v39  ;;  %v458_v4 = vmul.f32 %v655_v39, %v655_v39 }
  0xdf   : > { %v462_v36 = vadd.f32 %v461_v33, %v447_v32  ;;  %411 = vst [vmem:[%s737_s27 + $0x28] sm:$0xff] %v362_v34  ;;  %v426_v37 = vadd.f32 %v425_v31, %v362_v34  ;;  %v448_v38 = vmul.f32 %v362_v34, %v362_v34  ;;  %v394_v43 = vpop.f32.mrf.mxu1 }
  0xe0   : > { %419 = vst [vmem:[%s737_s27 + $0x68] sm:$0xff] %v394_v43  ;;  %v456_v0 = vmul.f32 %v394_v43, %v394_v43 }
  0xe1   : > { %v427_v41 = vadd.f32 %v646_v19, %v426_v37  ;;  %v463_v42 = vadd.f32 %v462_v36, %v448_v38 }
  0xe3   : > { %v428_v45 = vadd.f32 %v647_v29, %v427_v41  ;;  %v464_v46 = vadd.f32 %v463_v42, %v449_v40 }
  0xe5   : > { %v465_v48 = vadd.f32 %v464_v46, %v450_v44  ;;  %v429_v49 = vadd.f32 %v428_v45, %v375_v15 }
  0xe7   : > { %v430_v50 = vadd.f32 %v429_v49, %v378_v25  ;;  %v466_v52 = vadd.f32 %v465_v48, %v451_v47 }
  0xe9   : > { %v431_v54 = vadd.f32 %v650_v13, %v430_v50  ;;  %v467_v55 = vadd.f32 %v466_v52, %v452_v51 }
  0xeb   : > { %v468_v57 = vadd.f32 %v467_v55, %v453_v53  ;;  %v432_v58 = vadd.f32 %v651_v20, %v431_v54 }
  0xed   : > { %v433_v59 = vadd.f32 %v432_v58, %v391_v35  ;;  %v469_v61 = vadd.f32 %v468_v57, %v454_v56 }
  0xef   : > { %v470_v62 = vadd.f32 %v469_v61, %v455_v60  ;;  %v434_v63 = vadd.f32 %v433_v59, %v394_v43 }
  0xf1   : > { %v435_v2 = vadd.f32 %v654_v30, %v434_v63  ;;  %v471_v3 = vadd.f32 %v470_v62, %v456_v0 }
  0xf3   : > { %v436_v5 = vadd.f32 %v655_v39, %v435_v2  ;;  %v472_v6 = vadd.f32 %v471_v3, %v457_v1 }
  0xf5   : > { %v437_v7 = vrot.slane %v436_v5, 4  ;;  %v473_v8 = vadd.f32 %v472_v6, %v458_v4 }
  0xf7   : > { %v438_v9 = vadd.f32 %v437_v7, %v436_v5  ;;  %v474_v10 = vrot.slane %v473_v8, 4 }
  0xf9   : > { %v439_v11 = vrot.slane %v438_v9, 2  ;;  %v475_v12 = vadd.f32 %v474_v10, %v473_v8 }
  0xfb   : > { %v440_v13 = vadd.f32 %v439_v11, %v438_v9  ;;  %v476_v14 = vrot.slane %v475_v12, 2 }
  0xfd   : > { %v441_v15 = vrot.slane %v440_v13, 1  ;;  %v477_v16 = vadd.f32 %v476_v14, %v475_v12 }
  0xff   : > { %v442_v17 = vadd.f32 %v441_v15, %v440_v13  ;;  %v478_v18 = vrot.slane %v477_v16, 1 }
 0x101   : > { %v479_v19 = vadd.f32 %v478_v18, %v477_v16  ;;  %480 = vst [vmem:[%s217_s5] sm:$0xff] %v442_v17 }
 0x103   : > { %481 = vst [vmem:[%s221_s8] sm:$0xff] %v479_v19 }
 0x104 PF: > { %s15_s15 = sadd.s32 1, %s682_s15  }
 0x105   : > { %p12_p5 = scmp.ge.s32.totalorder %s15_s15, 6  }
 0x107   :  { %14 = sbr.rel (!%p12_p5) target bundleno = 1 (0x1), region = 82 }

// kernel: basic_block_forward.9
= control target key start
LH: loop header
LB: loop body
LE: loop exit
PB: predicated region body
PF: predicated region fallthrough
CT: control target
= control target key end

     0   :  { %s585_s21 = smov 0   ;;  %s748_s0 = inlined_call_operand.vmem [shape: f32[512,128], index: 0, kind: input, shape index: {}]   ;;  %s749_s1 = inlined_call_operand.vmem [shape: f32[1,128], index: 1, kind: input, shape index: {}]   ;;  %s750_s2 = inlined_call_operand.vmem [shape: f32[1,128], index: 2, kind: input, shape index: {}]   ;;  %s751_s3 = inlined_call_operand.vmem [shape: f32[512,128], index: 3, kind: input, shape index: {}]   ;;  %s752_s4 = inlined_call_operand.vmem [shape: f32[1,128], index: 4, kind: input, shape index: {}]   ;;  %s753_s5 = inlined_call_operand.vmem [shape: f32[1,128], index: 5, kind: input, shape index: {}]   ;;  %s754_s6 = inlined_call_operand.vmem [shape: f32[512,128], index: 6, kind: output, shape index: {}]  }
   0x1 LB: > { %s517_s22 = sadd.s32 4294967295, %s548_s21   ;;  %p521_p0 = scmp.ge.s32.totalorder %s548_s21, 1  ;;  %s548_s21 = sphi %s585_s21, %s16_s21  }
   0x2   : > { %p224_p1 = scmp.lt.s32.totalorder %s548_s21, 5 }
   0x4   : > { %p225_p2 = pnand %p521_p0, %p224_p1 }
   0x5   : > { %s522_s23 = sshll.u32 (!%p225_p2), %s517_s22, 4 }
   0x6   : > { %228 = sbr.rel (%p225_p2) target bundleno = 45 (0x2d), region = 44  ;;  %p260_p3 = scmp.lt.s32.totalorder (!%p225_p2), %s522_s23, 63 }
   0xb   : > { %s756_s23 = smov (!%p260_p3, %s522_s23), 63  ;;  %v598_v0 = vld [vmem:[%s749_s1] ss:$0 sm:$0xff] }
   0xc   : > { %s593_s24 = sshll.u32 %s756_s23, 3  ;;  %v603_v1 = vld [vmem:[%s752_s4] ss:$0 sm:$0xff] }
   0xd   : > { %s609_s7 = scalar_lea.vmem %s748_s0, %s593_s24  ;;  %s615_s10 = scalar_lea.vmem %s751_s3, %s593_s24  ;;  %v620_v2 = vld [vmem:[%s750_s2] ss:$0 sm:$0xff] }
   0xe   : > { %v625_v3 = vld [vmem:[%s753_s5] ss:$0 sm:$0xff]  ;;  %v278_v6 = vld [vmem:[%s609_s7 + $0x8] sm:$0xff]  ;;  %v279_v11 = vld [vmem:[%s609_s7 + $0x10] sm:$0xff]  ;;  %s660_s17 = scalar_lea.vmem %s754_s6, %s593_s24 }
   0xf   : > { %v277_v4 = vld [vmem:[%s609_s7] sm:$0xff]  ;;  %v301_v9 = vmul.f32 %v598_v0, %v278_v6  ;;  %v340_v10 = vld [vmem:[%s615_s10 + $0x8] sm:$0xff]  ;;  %v341_v12 = vld [vmem:[%s615_s10 + $0x10] sm:$0xff]  ;;  %v302_v14 = vmul.f32 %v598_v0, %v279_v11 }
  0x10   : > { %v339_v5 = vld [vmem:[%s615_s10] sm:$0xff]  ;;  %v300_v7 = vmul.f32 %v598_v0, %v277_v4  ;;  %v363_v13 = vmul.f32 %v603_v1, %v340_v10  ;;  %v364_v15 = vmul.f32 %v603_v1, %v341_v12  ;;  %v280_v16 = vld [vmem:[%s609_s7 + $0x18] sm:$0xff]  ;;  %v282_v24 = vld [vmem:[%s609_s7 + $0x28] sm:$0xff] }
  0x11   : > { %v362_v8 = vmul.f32 %v603_v1, %v339_v5  ;;  %v342_v17 = vld [vmem:[%s615_s10 + $0x18] sm:$0xff]  ;;  %v281_v18 = vld [vmem:[%s609_s7 + $0x20] sm:$0xff]  ;;  %v324_v21 = vadd.f32 %v620_v2, %v301_v9  ;;  %v303_v22 = vmul.f32 %v598_v0, %v280_v16  ;;  %v325_v26 = vadd.f32 %v620_v2, %v302_v14  ;;  %v344_v29 = vld [vmem:[%s615_s10 + $0x28] sm:$0xff] }
  0x12   : > { %v323_v19 = vadd.f32 %v620_v2, %v300_v7  ;;  %v343_v23 = vld [vmem:[%s615_s10 + $0x20] sm:$0xff]  ;;  %v386_v25 = vadd.f32 %v625_v3, %v363_v13  ;;  %v387_v27 = vadd.f32 %v625_v3, %v364_v15  ;;  %v365_v28 = vmul.f32 %v603_v1, %v342_v17  ;;  %v283_v38 = vld [vmem:[%s609_s7 + $0x30] sm:$0xff]  ;;  %v284_v44 = vld [vmem:[%s609_s7 + $0x38] sm:$0xff] }
  0x13   : > { %v385_v20 = vadd.f32 %v625_v3, %v362_v8  ;;  %v326_v31 = vadd.f32 %v620_v2, %v303_v22  ;;  %v304_v32 = vmul.f32 %v598_v0, %v281_v18  ;;  %v366_v33 = vmul.f32 %v603_v1, %v343_v23  ;;  %v345_v39 = vld [vmem:[%s615_s10 + $0x30] sm:$0xff]  ;;  %v346_v45 = vld [vmem:[%s615_s10 + $0x38] sm:$0xff]  ;;  %v285_v46 = vld [vmem:[%s609_s7 + $0x40] sm:$0xff] }
  0x14   : > { %v402_v34 = vadd.f32 %v386_v25, %v324_v21  ;;  %v403_v35 = vadd.f32 %v387_v27, %v325_v26  ;;  %v388_v36 = vadd.f32 %v625_v3, %v365_v28  ;;  %v305_v37 = vmul.f32 %v598_v0, %v282_v24  ;;  %v347_v55 = vld [vmem:[%s615_s10 + $0x40] sm:$0xff]  ;;  %v286_v60 = vld [vmem:[%s609_s7 + $0x48] sm:$0xff]  ;;  %v287_v6 = vld [vmem:[%s609_s7 + $0x50] sm:$0xff] }
  0x15   : > { %v401_v30 = vadd.f32 %v385_v20, %v323_v19  ;;  %v327_v41 = vadd.f32 %v620_v2, %v304_v32  ;;  %v389_v42 = vadd.f32 %v625_v3, %v366_v33  ;;  %v367_v43 = vmul.f32 %v603_v1, %v344_v29  ;;  %v348_v61 = vld [vmem:[%s615_s10 + $0x48] sm:$0xff]  ;;  %v349_v7 = vld [vmem:[%s615_s10 + $0x50] sm:$0xff]  ;;  %v288_v12 = vld [vmem:[%s609_s7 + $0x58] sm:$0xff] }
  0x16   : > { %v418_v47 = vmax.f32 %v402_v34, 0.0  ;;  %v419_v48 = vmax.f32 %v403_v35, 0.0  ;;  %v404_v49 = vadd.f32 %v388_v36, %v326_v31  ;;  %v328_v50 = vadd.f32 %v620_v2, %v305_v37  ;;  %v350_v21 = vld [vmem:[%s615_s10 + $0x58] sm:$0xff]  ;;  %v289_v22 = vld [vmem:[%s609_s7 + $0x60] sm:$0xff]  ;;  %v290_v28 = vld [vmem:[%s609_s7 + $0x68] sm:$0xff] }
  0x17   : > { %v417_v40 = vmax.f32 %v401_v30, 0.0  ;;  %v405_v51 = vadd.f32 %v389_v42, %v327_v41  ;;  %v390_v52 = vadd.f32 %v625_v3, %v367_v43  ;;  %v306_v53 = vmul.f32 %v598_v0, %v283_v38  ;;  %v351_v27 = vld [vmem:[%s615_s10 + $0x60] sm:$0xff]  ;;  %v352_v33 = vld [vmem:[%s615_s10 + $0x68] sm:$0xff]  ;;  %v291_v38 = vld [vmem:[%s609_s7 + $0x70] sm:$0xff] }
  0x18   : > { %v368_v54 = vmul.f32 %v603_v1, %v345_v39  ;;  %434 = vst [vmem:[%s660_s17 + $0x8] sm:$0xff] %v418_v47  ;;  %435 = vst [vmem:[%s660_s17 + $0x10] sm:$0xff] %v419_v48  ;;  %v420_v56 = vmax.f32 %v404_v49, 0.0  ;;  %v307_v57 = vmul.f32 %v598_v0, %v284_v44  ;;  %v369_v58 = vmul.f32 %v603_v1, %v346_v45  ;;  %v353_v43 = vld [vmem:[%s615_s10 + $0x70] sm:$0xff]  ;;  %v292_v44 = vld [vmem:[%s609_s7 + $0x78] sm:$0xff] }
  0x19   : > { %433 = vst [vmem:[%s660_s17] sm:$0xff] %v417_v40  ;;  %v308_v59 = vmul.f32 %v598_v0, %v285_v46  ;;  %v421_v62 = vmax.f32 %v405_v51, 0.0  ;;  %v406_v63 = vadd.f32 %v390_v52, %v328_v50  ;;  %v329_v4 = vadd.f32 %v620_v2, %v306_v53  ;;  %v354_v49 = vld [vmem:[%s615_s10 + $0x78] sm:$0xff] }
  0x1a   : > { %v391_v5 = vadd.f32 %v625_v3, %v368_v54  ;;  %436 = vst [vmem:[%s660_s17 + $0x18] sm:$0xff] %v420_v56  ;;  %v330_v8 = vadd.f32 %v620_v2, %v307_v57  ;;  %v392_v9 = vadd.f32 %v625_v3, %v369_v58  ;;  %v370_v11 = vmul.f32 %v603_v1, %v347_v55 }
  0x1b   : > { %v331_v10 = vadd.f32 %v620_v2, %v308_v59  ;;  %437 = vst [vmem:[%s660_s17 + $0x20] sm:$0xff] %v421_v62  ;;  %v422_v13 = vmax.f32 %v406_v63, 0.0  ;;  %v309_v15 = vmul.f32 %v598_v0, %v286_v60  ;;  %v371_v16 = vmul.f32 %v603_v1, %v348_v61 }
  0x1c   : > { %v407_v14 = vadd.f32 %v391_v5, %v329_v4  ;;  %v408_v17 = vadd.f32 %v392_v9, %v330_v8  ;;  %v393_v18 = vadd.f32 %v625_v3, %v370_v11  ;;  %v310_v19 = vmul.f32 %v598_v0, %v287_v6 }
  0x1d   : > { %v372_v20 = vmul.f32 %v603_v1, %v349_v7  ;;  %438 = vst [vmem:[%s660_s17 + $0x28] sm:$0xff] %v422_v13  ;;  %v332_v24 = vadd.f32 %v620_v2, %v309_v15  ;;  %v394_v25 = vadd.f32 %v625_v3, %v371_v16  ;;  %v311_v26 = vmul.f32 %v598_v0, %v288_v12 }
  0x1e   : > { %v423_v23 = vmax.f32 %v407_v14, 0.0  ;;  %v424_v29 = vmax.f32 %v408_v17, 0.0  ;;  %v409_v30 = vadd.f32 %v393_v18, %v331_v10  ;;  %v333_v31 = vadd.f32 %v620_v2, %v310_v19 }
  0x1f   : > { %v395_v32 = vadd.f32 %v625_v3, %v372_v20  ;;  %v410_v34 = vadd.f32 %v394_v25, %v332_v24  ;;  %v334_v35 = vadd.f32 %v620_v2, %v311_v26  ;;  %v373_v36 = vmul.f32 %v603_v1, %v350_v21 }
  0x20   : > { %439 = vst [vmem:[%s660_s17 + $0x30] sm:$0xff] %v423_v23  ;;  %v312_v37 = vmul.f32 %v598_v0, %v289_v22  ;;  %440 = vst [vmem:[%s660_s17 + $0x38] sm:$0xff] %v424_v29  ;;  %v425_v39 = vmax.f32 %v409_v30, 0.0  ;;  %v374_v41 = vmul.f32 %v603_v1, %v351_v27  ;;  %v313_v42 = vmul.f32 %v598_v0, %v290_v28 }
  0x21   : > { %v411_v40 = vadd.f32 %v395_v32, %v333_v31  ;;  %v426_v45 = vmax.f32 %v410_v34, 0.0  ;;  %v396_v46 = vadd.f32 %v625_v3, %v373_v36  ;;  %v375_v48 = vmul.f32 %v603_v1, %v352_v33 }
  0x22   : > { %v335_v47 = vadd.f32 %v620_v2, %v312_v37  ;;  %441 = vst [vmem:[%s660_s17 + $0x40] sm:$0xff] %v425_v39  ;;  %v397_v51 = vadd.f32 %v625_v3, %v374_v41  ;;  %v336_v52 = vadd.f32 %v620_v2, %v313_v42  ;;  %v314_v53 = vmul.f32 %v598_v0, %v291_v38 }
  0x23   : > { %v427_v50 = vmax.f32 %v411_v40, 0.0  ;;  %442 = vst [vmem:[%s660_s17 + $0x48] sm:$0xff] %v426_v45  ;;  %v412_v54 = vadd.f32 %v396_v46, %v334_v35  ;;  %v398_v55 = vadd.f32 %v625_v3, %v375_v48  ;;  %v376_v56 = vmul.f32 %v603_v1, %v353_v43 }
  0x24   : > { %v315_v57 = vmul.f32 %v598_v0, %v292_v44  ;;  %v413_v58 = vadd.f32 %v397_v51, %v335_v47  ;;  %v337_v59 = vadd.f32 %v620_v2, %v314_v53  ;;  %v377_v60 = vmul.f32 %v603_v1, %v354_v49 }
  0x25   : > { %443 = vst [vmem:[%s660_s17 + $0x50] sm:$0xff] %v427_v50  ;;  %v428_v61 = vmax.f32 %v412_v54, 0.0  ;;  %v414_v62 = vadd.f32 %v398_v55, %v336_v52  ;;  %v399_v63 = vadd.f32 %v625_v3, %v376_v56 }
  0x26   : > { %v338_v4 = vadd.f32 %v620_v2, %v315_v57  ;;  %v429_v5 = vmax.f32 %v413_v58, 0.0  ;;  %v400_v6 = vadd.f32 %v625_v3, %v377_v60 }
  0x27   : > { %444 = vst [vmem:[%s660_s17 + $0x58] sm:$0xff] %v428_v61  ;;  %v430_v0 = vmax.f32 %v414_v62, 0.0  ;;  %v415_v7 = vadd.f32 %v399_v63, %v337_v59 }
  0x28   : > { %445 = vst [vmem:[%s660_s17 + $0x60] sm:$0xff] %v429_v5  ;;  %v416_v8 = vadd.f32 %v400_v6, %v338_v4 }
  0x29   : > { %446 = vst [vmem:[%s660_s17 + $0x68] sm:$0xff] %v430_v0  ;;  %v431_v9 = vmax.f32 %v415_v7, 0.0 }
  0x2a   : > { %v432_v10 = vmax.f32 %v416_v8, 0.0 }
  0x2b   : > { %447 = vst [vmem:[%s660_s17 + $0x70] sm:$0xff] %v431_v9 }
  0x2c   : > { %448 = vst [vmem:[%s660_s17 + $0x78] sm:$0xff] %v432_v10 }
  0x2d PF: > { %s16_s21 = sadd.s32 1, %s548_s21  }
  0x2e   : > { %p13_p4 = scmp.ge.s32.totalorder %s16_s21, 6  }
  0x30   :  { %15 = sbr.rel (!%p13_p4) target bundleno = 1 (0x1), region = 77 }

</bundles_post_ra>
